<compile_context>
chip_gen: v7x
topology: tpu7x:2x2x1
jax: 0.10.0
libtpu: 0.0.40
codegen_flags: <defaults>
</compile_context>

<pallas_src>
import math
from functools import partial

import jax
import jax.numpy as jnp
from jax import lax
from jax.experimental import pallas as pl
from jax.experimental.pallas import tpu as pltpu

BN_EPS = 1e-5


# ----------------------------------------------------------------------------
# Tiling / compiler-parameter helpers
# ----------------------------------------------------------------------------
def _round_up(v, m):
    return -(-v // m) * m


def _vmem_limit_bytes():
    """Per-generation scoped-VMEM cap (v7x only has 64 MiB per TensorCore)."""
    try:
        cap = pltpu.get_tpu_info().vmem_capacity_bytes
        return int(min(cap // 2, 48 * 1024 * 1024))
    except Exception:
        return 32 * 1024 * 1024  # conservative, valid on every generation


_VMEM_LIMIT = _vmem_limit_bytes()


def _pick_tm(m, widest):
    """Row tile for the 1x1 matmul kernels: fixed large tile + ragged-tail grid
    (no divisor search).  Shrinks only to keep >=4 grid steps (pipelining /
    megacore) and uses 256 rows when the layer is very wide (v7x VMEM)."""
    tm = 256 if widest >= 1024 else 512
    while tm > 64 and -(-m // tm) < 4:
        tm //= 2
    return max(8, min(tm, _round_up(m, 8)))


def _pick_th(ho):
    """Output-row tile for the 3x3 kernel (multiple of 8, >=4 blocks if possible)."""
    th = 64
    while th > 8 and -(-ho // th) < 4:
        th //= 2
    return th


# ----------------------------------------------------------------------------
# Pallas kernels
# ----------------------------------------------------------------------------
def _matmul_bn_kernel(apply_relu, has_residual, has_shortcut):
    """(TM,Cin)@(Cin,Cout) -> BN -> (+bf16 residual | +fused shortcut 1x1) -> ReLU."""

    def kernel(*refs):
        x_ref, w_ref, sb_ref = refs[0], refs[1], refs[2]
        i = 3
        res_ref = None
        if has_residual:
            res_ref = refs[i]
            i += 1
        xs_ref = ws_ref = sbs_ref = None
        if has_shortcut:
            xs_ref, ws_ref, sbs_ref = refs[i], refs[i + 1], refs[i + 2]
            i += 3
        o_ref = refs[i]

        y = jnp.dot(x_ref[...], w_ref[...], preferred_element_type=jnp.float32)
        y = y * sb_ref[0:1, :] + sb_ref[1:2, :]
        if has_residual:                       # identity shortcut (bf16 in HBM)
            y = y + res_ref[...].astype(jnp.float32)
        if has_shortcut:                       # fused downsample 1x1 conv + BN
            ys = jnp.dot(xs_ref[...], ws_ref[...],
                         preferred_element_type=jnp.float32)
            y = y + ys * sbs_ref[0:1, :] + sbs_ref[1:2, :]
        if apply_relu:
            y = jnp.maximum(y, 0.0)
        # TODO(synk): lane-dense packing (two rows folded into the lane dim)
        #             when cout < 128 would remove masked partial stores.
        o_ref[...] = y.astype(o_ref.dtype)

    return kernel


def _conv3x3_bn_relu_kernel(s, th, wpp, wo):
    """3x3 conv, one TH-row output block per grid step.

    Input phases are pre-flattened to (hpp*wpp, Cin) with wpp % 8 == 0, so each
    of the 9 taps is an aligned row-slab load (+ a <=2-row static shift for the
    kw offset) feeding a plain 2D MXU matmul; padded columns are removed by a
    single prefix slice of the accumulator at the end.
    """
    L = th * wpp

    def kernel(xph_ref, w_ref, sb_ref, o_ref):
        cout = w_ref.shape[-1]
        h0 = pl.program_id(1) * th
        acc = jnp.zeros((L, cout), jnp.float32)
        for kh in range(3):                       # static, fully unrolled taps
            for kw in range(3):
                p = (kh % s) * s + (kw % s)       # stride phase holding the tap
                r0, c0 = kh // s, kw // s
                start = pl.multiple_of((h0 + r0) * wpp, 8)
                if c0 == 0:
                    xt = xph_ref[p, pl.ds(start, L), :]
                else:
                    # aligned over-read of one extra sublane tile, then a small
                    # static shift -- no windowed-copy / reshape relayout.
                    xt = xph_ref[p, pl.ds(start, L + 8), :][c0:c0 + L, :]
                acc = acc + jnp.dot(xt, w_ref[kh * 3 + kw],
                                    preferred_element_type=jnp.float32)
        y = acc * sb_ref[0:1, :] + sb_ref[1:2, :]
        y = jnp.maximum(y, 0.0)
        # Single prefix slice drops the padded (garbage) columns.
        y = y.reshape(th, wpp, cout)[:, :wo, :]
        o_ref[...] = y.astype(o_ref.dtype)

    return kernel


# ----------------------------------------------------------------------------
# pallas_call wrappers
# ----------------------------------------------------------------------------
def conv1x1_bn(x2d, w, sb, *, relu, residual=None, shortcut=None,
               out_dtype=jnp.bfloat16):
    """1x1 conv (matmul over flattened NHW rows) + folded BN.

    `residual`: bf16 (M, Cout) tensor added post-BN (identity shortcut).
    `shortcut`: (xs2d, ws, sbs) -- downsample 1x1 conv + BN fused in-kernel.
    """
    m, cin = x2d.shape
    cout = w.shape[1]
    tm = _pick_tm(m, max(cin, cout))
    grid = (-(-m // tm),)

    inputs = [x2d.astype(jnp.bfloat16), w.astype(jnp.bfloat16),
              sb.astype(jnp.float32)]
    # TODO(synk): the constant-index weight/scale specs could request
    #             pipeline_mode=pl.Buffered(1) to reclaim their second buffer.
    in_specs = [pl.BlockSpec((tm, cin), lambda i: (i, 0)),
                pl.BlockSpec((cin, cout), lambda i: (0, 0)),      # resident
                pl.BlockSpec((2, cout), lambda i: (0, 0))]
    flops = 2 * m * cin * cout
    bytes_accessed = (m * cin * 2 + cin * cout * 2 + 2 * cout * 4
                      + m * cout * jnp.dtype(out_dtype).itemsize)

    if residual is not None:
        inputs.append(residual.astype(jnp.bfloat16))
        in_specs.append(pl.BlockSpec((tm, cout), lambda i: (i, 0)))
        bytes_accessed += m * cout * 2
    if shortcut is not None:
        xs2d, ws, sbs = shortcut
        cin_s = xs2d.shape[1]
        inputs += [xs2d.astype(jnp.bfloat16), ws.astype(jnp.bfloat16),
                   sbs.astype(jnp.float32)]
        in_specs += [pl.BlockSpec((tm, cin_s), lambda i: (i, 0)),
                     pl.BlockSpec((cin_s, cout), lambda i: (0, 0)),
                     pl.BlockSpec((2, cout), lambda i: (0, 0))]
        flops += 2 * m * cin_s * cout
        bytes_accessed += m * cin_s * 2 + cin_s * cout * 2 + 2 * cout * 4

    return pl.pallas_call(
        _matmul_bn_kernel(relu, residual is not None, shortcut is not None),
        out_shape=jax.ShapeDtypeStruct((m, cout), out_dtype),
        grid=grid,
        in_specs=in_specs,
        out_specs=pl.BlockSpec((tm, cout), lambda i: (i, 0)),
        compiler_params=pltpu.CompilerParams(
            dimension_semantics=("parallel",),
            vmem_limit_bytes=_VMEM_LIMIT),
        cost_estimate=pl.CostEstimate(flops=int(flops), transcendentals=0,
                                      bytes_accessed=int(bytes_accessed)),
    )(*inputs)


def conv3x3_bn_relu(x, wgt, sb, *, stride, out_dtype=jnp.bfloat16):
    """3x3 conv (padding=1, stride s) + folded BN + ReLU.  x: (N,H,W,Cin)."""
    N, H, W, Cin = x.shape
    Cout = wgt.shape[-1]
    s = stride
    Ho = (H - 1) // s + 1
    Wo = (W - 1) // s + 1
    r0max = 2 // s
    c0max = 2 // s

    th = _pick_th(Ho)
    n_hblk = -(-Ho // th)
    wpp = _round_up(Wo + c0max, 8)            # phase width, multiple of 8
    hpp = n_hblk * th + r0max + 1             # + spare rows for shifted over-reads

    # Host prep: one zero-pad (+ stride-phase split for s>1).  Same order of
    # bytes as the input -- NOT an im2col blowup.
    xb = x.astype(jnp.bfloat16)
    xp = jnp.pad(xb, ((0, 0), (1, hpp * s - H - 1), (1, wpp * s - W - 1), (0, 0)))
    if s == 1:
        xph = xp[:, None]                                        # (N,1,hpp,wpp,C)
    else:
        # phase(pr,pc)[r,c] == xp[r*s+pr, c*s+pc] -> every tap is a contiguous
        # row slab of one phase.
        xph = jnp.stack([xp[:, pr::s, pc::s, :]
                         for pr in range(s) for pc in range(s)], axis=1)
    xph = xph.reshape(N, s * s, hpp * wpp, Cin)   # flatten rows (layout-free)

    w9 = wgt.reshape(9, Cin, Cout).astype(jnp.bfloat16)
    sb = sb.astype(jnp.float32)

    bytes_accessed = (xph.size * 2 + w9.size * 2 + sb.size * 4
                      + N * Ho * Wo * Cout * jnp.dtype(out_dtype).itemsize)
    # TODO(synk): for very large images switch the x BlockSpec to halo'd
    #             row-block DMAs instead of one resident per-image block.
    return pl.pallas_call(
        _conv3x3_bn_relu_kernel(s, th, wpp, Wo),
        out_shape=jax.ShapeDtypeStruct((N, Ho, Wo, Cout), out_dtype),
        grid=(N, n_hblk),
        in_specs=[
            pl.BlockSpec((None, s * s, hpp * wpp, Cin), lambda n, j: (n, 0, 0, 0)),
            pl.BlockSpec((9, Cin, Cout), lambda n, j: (0, 0, 0)),   # resident
            pl.BlockSpec((2, Cout), lambda n, j: (0, 0)),
        ],
        out_specs=pl.BlockSpec((None, th, Wo, Cout), lambda n, j: (n, j, 0, 0)),
        compiler_params=pltpu.CompilerParams(
            dimension_semantics=("parallel", "parallel"),
            vmem_limit_bytes=_VMEM_LIMIT),
        cost_estimate=pl.CostEstimate(flops=2 * N * Ho * Wo * 9 * Cin * Cout,
                                      transcendentals=0,
                                      bytes_accessed=int(bytes_accessed)),
    )(xph, w9, sb)


# ----------------------------------------------------------------------------
# Parameters (deterministic) and forward pass
# ----------------------------------------------------------------------------
def fold_bn(gamma, beta, running_mean, running_var, eps=BN_EPS):
    scale = gamma / jnp.sqrt(running_var + eps)
    return jnp.stack([scale, beta - running_mean * scale])      # (2, C)


def _identity_bn(c):
    # Eval-mode BN with identity running stats (gamma=1, beta=0, mean=0, var=1).
    return fold_bn(jnp.ones((c,), jnp.float32), jnp.zeros((c,), jnp.float32),
                   jnp.zeros((c,), jnp.float32), jnp.ones((c,), jnp.float32))


def init_bottleneck_params(key, inp, oup, stride):
    c4 = 4 * oup
    k1, k2, k3, k4 = jax.random.split(key, 4)

    def conv_w(k, kh, kw, cin, cout):
        std = math.sqrt(2.0 / (kh * kw * cin))
        return jax.random.normal(k, (kh, kw, cin, cout), jnp.float32) * std

    p = {
        "w1": conv_w(k1, 1, 1, inp, oup).reshape(inp, oup),
        "bn1": _identity_bn(oup),
        "w2": conv_w(k2, 3, 3, oup, oup),
        "bn2": _identity_bn(oup),
        "w3": conv_w(k3, 1, 1, oup, c4).reshape(oup, c4),
        "bn3": _identity_bn(c4),
    }
    if stride != 1 or inp != c4:
        p["ws"] = conv_w(k4, 1, 1, inp, c4).reshape(inp, c4)
        p["bns"] = _identity_bn(c4)
    return p


@partial(jax.jit, static_argnames=("stride",))
def bottleneck_forward(params, x_nchw, *, stride):
    x = jnp.transpose(x_nchw, (0, 2, 3, 1))                     # NCHW -> NHWC
    N, H, W, Cin = x.shape
    oup = params["w1"].shape[1]
    c4 = params["w3"].shape[1]
    xb = x.astype(jnp.bfloat16)

    # conv1 (1x1) + BN + ReLU                -> bf16 intermediate
    h = conv1x1_bn(xb.reshape(N * H * W, Cin), params["w1"], params["bn1"],
                   relu=True, out_dtype=jnp.bfloat16).reshape(N, H, W, oup)
    # conv2 (3x3, stride, pad=1) + BN + ReLU -> bf16 intermediate
    h = conv3x3_bn_relu(h, params["w2"], params["bn2"], stride=stride)
    _, Ho, Wo, _ = h.shape
    h2d = h.reshape(N * Ho * Wo, oup)

    # conv3 (1x1) + BN with the shortcut fused into the same kernel,
    # followed by the final ReLU.
    if "ws" in params:
        xs = xb[:, ::stride, ::stride, :].reshape(N * Ho * Wo, Cin)
        y = conv1x1_bn(h2d, params["w3"], params["bn3"], relu=True,
                       shortcut=(xs, params["ws"], params["bns"]),
                       out_dtype=jnp.bfloat16)
    else:
        assert stride == 1 and Cin == c4, (
            "identity shortcut requires stride == 1 and inp == 4 * oup")
        y = conv1x1_bn(h2d, params["w3"], params["bn3"], relu=True,
                       residual=xb.reshape(N * H * W, c4),
                       out_dtype=jnp.bfloat16)
    y = y.reshape(N, Ho, Wo, c4)
    return jnp.transpose(y, (0, 3, 1, 2)).astype(jnp.float32)   # -> NCHW


# ----------------------------------------------------------------------------
# Pure-JAX reference (same bf16 rounding points as the kernels)
# ----------------------------------------------------------------------------
def _conv_ref(x, wgt, stride, pad):
    return lax.conv_general_dilated(
        x.astype(jnp.bfloat16), wgt.astype(jnp.bfloat16),
        window_strides=(stride, stride), padding=[(pad, pad), (pad, pad)],
        dimension_numbers=("NHWC", "HWIO", "NHWC"),
        preferred_element_type=jnp.float32)


def bottleneck_ref(params, x_nchw, stride):
    x = jnp.transpose(x_nchw, (0, 2, 3, 1)).astype(jnp.float32)
    xb = x.astype(jnp.bfloat16)
    inp = x.shape[-1]
    oup = params["w1"].shape[1]
    c4 = params["w3"].shape[1]
    s1, b1 = params["bn1"][0], params["bn1"][1]
    s2, b2 = params["bn2"][0], params["bn2"][1]
    s3, b3 = params["bn3"][0], params["bn3"][1]

    h = _conv_ref(xb, params["w1"].reshape(1, 1, inp, oup), 1, 0) * s1 + b1
    h = jnp.maximum(h, 0.0).astype(jnp.bfloat16)
    h = _conv_ref(h, params["w2"], stride, 1) * s2 + b2
    h = jnp.maximum(h, 0.0).astype(jnp.bfloat16)
    h = _conv_ref(h, params["w3"].reshape(1, 1, oup, c4), 1, 0) * s3 + b3
    if "ws" in params:
        ss, bs = params["bns"][0], params["bns"][1]
        sc = _conv_ref(xb, params["ws"].reshape(1, 1, inp, c4), stride, 0) * ss + bs
    else:
        sc = xb.astype(jnp.float32)
    return jnp.transpose(jnp.maximum(h + sc, 0.0), (0, 3, 1, 2))


def _max_err(a, b):
    a = jnp.asarray(a, jnp.float32)
    b = jnp.asarray(b, jnp.float32)
    return float(jnp.max(jnp.abs(a - b) / (1.0 + jnp.abs(b))))


# ----------------------------------------------------------------------------
# Main
# ----------------------------------------------------------------------------
if __name__ == "__main__":
    key = jax.random.PRNGKey(0)
    kp1, kp2, kx1, kx2 = jax.random.split(key, 4)

    # Case 1: stride=1, inp == oup*expansion -> identity shortcut.
    inp1, oup1, st1 = 64, 16, 1
    params1 = init_bottleneck_params(kp1, inp1, oup1, st1)
    x1 = jax.random.normal(kx1, (2, inp1, 16, 16), jnp.float32)       # NCHW
    out1 = jax.block_until_ready(bottleneck_forward(params1, x1, stride=st1))
    assert out1.shape == (2, 4 * oup1, 16, 16), out1.shape
    err1 = _max_err(out1, bottleneck_ref(params1, x1, st1))
    assert err1 < 2e-2, f"case1 max rel err {err1}"

    # Case 2: stride=2, inp != oup*expansion -> fused conv shortcut + strided 3x3.
    inp2, oup2, st2 = 32, 16, 2
    params2 = init_bottleneck_params(kp2, inp2, oup2, st2)
    x2 = jax.random.normal(kx2, (2, inp2, 16, 16), jnp.float32)
    out2 = jax.block_until_ready(bottleneck_forward(params2, x2, stride=st2))
    assert out2.shape == (2, 4 * oup2, 8, 8), out2.shape
    err2 = _max_err(out2, bottleneck_ref(params2, x2, st2))
    assert err2 < 2e-2, f"case2 max rel err {err2}"

    print("KERNEL_OK")
</pallas_src>

<mosaic_0001>
module attributes {stable_mosaic.version = 11 : i64} {
  func.func @kernel(%arg0: i32, %arg1: memref<128x64xbf16, #tpu.memory_space<vmem>>, %arg2: memref<64x16xbf16, #tpu.memory_space<vmem>>, %arg3: memref<2x16xf32, #tpu.memory_space<vmem>>, %arg4: memref<128x16xbf16, #tpu.memory_space<vmem>>) attributes {dimension_semantics = [#tpu.dimension_semantics<parallel>], iteration_bounds = array<i64: 4>, scalar_prefetch = 0 : i64, scratch_operands = 0 : i64, tpu.core_type = #tpu.core_type<tc>, window_params = [{transform_indices = @transform_0, window_bounds = array<i64: 128, 64>}, {pipeline_mode = #tpu.pipeline_mode<synchronous>, transform_indices = @transform_1, window_bounds = array<i64: 64, 16>}, {pipeline_mode = #tpu.pipeline_mode<synchronous>, transform_indices = @transform_2, window_bounds = array<i64: 2, 16>}, {transform_indices = @transform_3, window_bounds = array<i64: 128, 16>}]} {
    %c0 = arith.constant 0 : index
    %c0_0 = arith.constant 0 : index
    %0 = vector.load %arg1[%c0, %c0_0] : memref<128x64xbf16, #tpu.memory_space<vmem>>, vector<128x64xbf16>
    %c0_1 = arith.constant 0 : index
    %c0_2 = arith.constant 0 : index
    %1 = vector.load %arg2[%c0_1, %c0_2] : memref<64x16xbf16, #tpu.memory_space<vmem>>, vector<64x16xbf16>
    %cst = arith.constant dense<0.000000e+00> : vector<128x16xf32>
    %2 = tpu.matmul %0, %1, %cst {dimension_numbers = #tpu.dot_dimension_numbers<[1], [0], [0], [1], [0, 0, 1, 1], [], []>} : vector<128x64xbf16>, vector<64x16xbf16>, vector<128x16xf32> -> vector<128x16xf32>
    %c0_3 = arith.constant 0 : index
    %c0_4 = arith.constant 0 : index
    %3 = vector.load %arg3[%c0_3, %c0_4] : memref<2x16xf32, #tpu.memory_space<vmem>>, vector<1x16xf32>
    %4 = vector.broadcast %3 : vector<1x16xf32> to vector<128x16xf32>
    %5 = arith.mulf %2, %4 : vector<128x16xf32>
    %c1 = arith.constant 1 : index
    %c0_5 = arith.constant 0 : index
    %6 = vector.load %arg3[%c1, %c0_5] : memref<2x16xf32, #tpu.memory_space<vmem>>, vector<1x16xf32>
    %7 = vector.broadcast %6 : vector<1x16xf32> to vector<128x16xf32>
    %8 = arith.addf %5, %7 : vector<128x16xf32>
    %cst_6 = arith.constant 0.000000e+00 : f32
    %9 = vector.broadcast %cst_6 : f32 to vector<128x16xf32>
    %10 = arith.maximumf %8, %9 : vector<128x16xf32>
    %11 = arith.truncf %10 : vector<128x16xf32> to vector<128x16xbf16>
    %c0_7 = arith.constant 0 : index
    %c0_8 = arith.constant 0 : index
    %12 = vector.load %arg4[%c0_7, %c0_8] : memref<128x16xbf16, #tpu.memory_space<vmem>>, vector<128x16xbf16>
    tpu.vector_store %arg4[%c0_7, %c0_8], %11 {strides = array<i32>} : memref<128x16xbf16, #tpu.memory_space<vmem>>, vector<128x16xbf16>,
    return
  }
  func.func @transform_0(%arg0: i32) -> (i32, i32) {
    %c0_i32 = arith.constant 0 : i32
    %c0_i32_0 = arith.constant 0 : i32
    return %arg0, %c0_i32 : i32, i32
  }
  func.func @transform_1(%arg0: i32) -> (i32, i32) {
    %c0_i32 = arith.constant 0 : i32
    %c0_i32_0 = arith.constant 0 : i32
    %c0_i32_1 = arith.constant 0 : i32
    return %c0_i32, %c0_i32_0 : i32, i32
  }
  func.func @transform_2(%arg0: i32) -> (i32, i32) {
    %c0_i32 = arith.constant 0 : i32
    %c0_i32_0 = arith.constant 0 : i32
    %c0_i32_1 = arith.constant 0 : i32
    return %c0_i32, %c0_i32_0 : i32, i32
  }
  func.func @transform_3(%arg0: i32) -> (i32, i32) {
    %c0_i32 = arith.constant 0 : i32
    %c0_i32_0 = arith.constant 0 : i32
    return %arg0, %c0_i32 : i32, i32
  }
}

module attributes {stable_mosaic.version = 11 : i64} {
  func.func @kernel(%arg0: i32, %arg1: i32, %arg2: memref<1x1x456x16xbf16, #tpu.memory_space<vmem>>, %arg3: memref<9x16x16xbf16, #tpu.memory_space<vmem>>, %arg4: memref<2x16xf32, #tpu.memory_space<vmem>>, %arg5: memref<1x8x16x16xbf16, #tpu.memory_space<vmem>>) attributes {dimension_semantics = [#tpu.dimension_semantics<parallel>, #tpu.dimension_semantics<parallel>], iteration_bounds = array<i64: 2, 2>, scalar_prefetch = 0 : i64, scratch_operands = 0 : i64, tpu.core_type = #tpu.core_type<tc>, window_params = [{transform_indices = @transform_0, window_bounds = array<i64: 1, 1, 456, 16>}, {pipeline_mode = #tpu.pipeline_mode<synchronous>, transform_indices = @transform_1, window_bounds = array<i64: 9, 16, 16>}, {pipeline_mode = #tpu.pipeline_mode<synchronous>, transform_indices = @transform_2, window_bounds = array<i64: 2, 16>}, {transform_indices = @transform_3, window_bounds = array<i64: 1, 8, 16, 16>}]} {
    %c8_i32 = arith.constant 8 : i32
    %0 = arith.muli %arg1, %c8_i32 : i32
    %cst = arith.constant 0.000000e+00 : f32
    %1 = vector.broadcast %cst : f32 to vector<192x16xf32>
    %c0_i32 = arith.constant 0 : i32
    %2 = arith.addi %0, %c0_i32 : i32
    %c24_i32 = arith.constant 24 : i32
    %3 = arith.muli %2, %c24_i32 : i32
    %4 = tpu.assume_multiple %3, 8 : i32
    %c0 = arith.constant 0 : index
    %c0_0 = arith.constant 0 : index
    %5 = arith.index_cast %4 : i32 to index
    %c0_1 = arith.constant 0 : index
    %6 = vector.load %arg2[%c0, %c0_0, %5, %c0_1] : memref<1x1x456x16xbf16, #tpu.memory_space<vmem>>, vector<1x1x192x16xbf16>
    %7 = vector.shape_cast %6 : vector<1x1x192x16xbf16> to vector<192x16xbf16>
    %c0_2 = arith.constant 0 : index
    %c0_3 = arith.constant 0 : index
    %c0_4 = arith.constant 0 : index
    %8 = vector.load %arg3[%c0_2, %c0_3, %c0_4] : memref<9x16x16xbf16, #tpu.memory_space<vmem>>, vector<1x16x16xbf16>
    %9 = vector.shape_cast %8 : vector<1x16x16xbf16> to vector<16x16xbf16>
    %cst_5 = arith.constant dense<0.000000e+00> : vector<192x16xf32>
    %10 = tpu.matmul %7, %9, %cst_5 {dimension_numbers = #tpu.dot_dimension_numbers<[1], [0], [0], [1], [0, 0, 1, 1], [], []>} : vector<192x16xbf16>, vector<16x16xbf16>, vector<192x16xf32> -> vector<192x16xf32>
    %11 = arith.addf %1, %10 : vector<192x16xf32>
    %c0_i32_6 = arith.constant 0 : i32
    %12 = arith.addi %0, %c0_i32_6 : i32
    %c24_i32_7 = arith.constant 24 : i32
    %13 = arith.muli %12, %c24_i32_7 : i32
    %14 = tpu.assume_multiple %13, 8 : i32
    %c0_8 = arith.constant 0 : index
    %c0_9 = arith.constant 0 : index
    %15 = arith.index_cast %14 : i32 to index
    %c0_10 = arith.constant 0 : index
    %16 = vector.load %arg2[%c0_8, %c0_9, %15, %c0_10] : memref<1x1x456x16xbf16, #tpu.memory_space<vmem>>, vector<1x1x200x16xbf16>
    %17 = vector.shape_cast %16 : vector<1x1x200x16xbf16> to vector<200x16xbf16>
    %18 = vector.extract_strided_slice %17 {offsets = [1, 0], sizes = [192, 16], strides = [1, 1]} : vector<200x16xbf16> to vector<192x16xbf16>
    %c1 = arith.constant 1 : index
    %c0_11 = arith.constant 0 : index
    %c0_12 = arith.constant 0 : index
    %19 = vector.load %arg3[%c1, %c0_11, %c0_12] : memref<9x16x16xbf16, #tpu.memory_space<vmem>>, vector<1x16x16xbf16>
    %20 = vector.shape_cast %19 : vector<1x16x16xbf16> to vector<16x16xbf16>
    %cst_13 = arith.constant dense<0.000000e+00> : vector<192x16xf32>
    %21 = tpu.matmul %18, %20, %cst_13 {dimension_numbers = #tpu.dot_dimension_numbers<[1], [0], [0], [1], [0, 0, 1, 1], [], []>} : vector<192x16xbf16>, vector<16x16xbf16>, vector<192x16xf32> -> vector<192x16xf32>
    %22 = arith.addf %11, %21 : vector<192x16xf32>
    %c0_i32_14 = arith.constant 0 : i32
    %23 = arith.addi %0, %c0_i32_14 : i32
    %c24_i32_15 = arith.constant 24 : i32
    %24 = arith.muli %23, %c24_i32_15 : i32
    %25 = tpu.assume_multiple %24, 8 : i32
    %c0_16 = arith.constant 0 : index
    %c0_17 = arith.constant 0 : index
    %26 = arith.index_cast %25 : i32 to index
    %c0_18 = arith.constant 0 : index
    %27 = vector.load %arg2[%c0_16, %c0_17, %26, %c0_18] : memref<1x1x456x16xbf16, #tpu.memory_space<vmem>>, vector<1x1x200x16xbf16>
    %28 = vector.shape_cast %27 : vector<1x1x200x16xbf16> to vector<200x16xbf16>
    %29 = vector.extract_strided_slice %28 {offsets = [2, 0], sizes = [192, 16], strides = [1, 1]} : vector<200x16xbf16> to vector<192x16xbf16>
    %c2 = arith.constant 2 : index
    %c0_19 = arith.constant 0 : index
    %c0_20 = arith.constant 0 : index
    %30 = vector.load %arg3[%c2, %c0_19, %c0_20] : memref<9x16x16xbf16, #tpu.memory_space<vmem>>, vector<1x16x16xbf16>
    %31 = vector.shape_cast %30 : vector<1x16x16xbf16> to vector<16x16xbf16>
    %cst_21 = arith.constant dense<0.000000e+00> : vector<192x16xf32>
    %32 = tpu.matmul %29, %31, %cst_21 {dimension_numbers = #tpu.dot_dimension_numbers<[1], [0], [0], [1], [0, 0, 1, 1], [], []>} : vector<192x16xbf16>, vector<16x16xbf16>, vector<192x16xf32> -> vector<192x16xf32>
    %33 = arith.addf %22, %32 : vector<192x16xf32>
    %c1_i32 = arith.constant 1 : i32
    %34 = arith.addi %0, %c1_i32 : i32
    %c24_i32_22 = arith.constant 24 : i32
    %35 = arith.muli %34, %c24_i32_22 : i32
    %36 = tpu.assume_multiple %35, 8 : i32
    %c0_23 = arith.constant 0 : index
    %c0_24 = arith.constant 0 : index
    %37 = arith.index_cast %36 : i32 to index
    %c0_25 = arith.constant 0 : index
    %38 = vector.load %arg2[%c0_23, %c0_24, %37, %c0_25] : memref<1x1x456x16xbf16, #tpu.memory_space<vmem>>, vector<1x1x192x16xbf16>
    %39 = vector.shape_cast %38 : vector<1x1x192x16xbf16> to vector<192x16xbf16>
    %c3 = arith.constant 3 : index
    %c0_26 = arith.constant 0 : index
    %c0_27 = arith.constant 0 : index
    %40 = vector.load %arg3[%c3, %c0_26, %c0_27] : memref<9x16x16xbf16, #tpu.memory_space<vmem>>, vector<1x16x16xbf16>
    %41 = vector.shape_cast %40 : vector<1x16x16xbf16> to vector<16x16xbf16>
    %cst_28 = arith.constant dense<0.000000e+00> : vector<192x16xf32>
    %42 = tpu.matmul %39, %41, %cst_28 {dimension_numbers = #tpu.dot_dimension_numbers<[1], [0], [0], [1], [0, 0, 1, 1], [], []>} : vector<192x16xbf16>, vector<16x16xbf16>, vector<192x16xf32> -> vector<192x16xf32>
    %43 = arith.addf %33, %42 : vector<192x16xf32>
    %c1_i32_29 = arith.constant 1 : i32
    %44 = arith.addi %0, %c1_i32_29 : i32
    %c24_i32_30 = arith.constant 24 : i32
    %45 = arith.muli %44, %c24_i32_30 : i32
    %46 = tpu.assume_multiple %45, 8 : i32
    %c0_31 = arith.constant 0 : index
    %c0_32 = arith.constant 0 : index
    %47 = arith.index_cast %46 : i32 to index
    %c0_33 = arith.constant 0 : index
    %48 = vector.load %arg2[%c0_31, %c0_32, %47, %c0_33] : memref<1x1x456x16xbf16, #tpu.memory_space<vmem>>, vector<1x1x200x16xbf16>
    %49 = vector.shape_cast %48 : vector<1x1x200x16xbf16> to vector<200x16xbf16>
    %50 = vector.extract_strided_slice %49 {offsets = [1, 0], sizes = [192, 16], strides = [1, 1]} : vector<200x16xbf16> to vector<192x16xbf16>
    %c4 = arith.constant 4 : index
    %c0_34 = arith.constant 0 : index
    %c0_35 = arith.constant 0 : index
    %51 = vector.load %arg3[%c4, %c0_34, %c0_35] : memref<9x16x16xbf16, #tpu.memory_space<vmem>>, vector<1x16x16xbf16>
    %52 = vector.shape_cast %51 : vector<1x16x16xbf16> to vector<16x16xbf16>
    %cst_36 = arith.constant dense<0.000000e+00> : vector<192x16xf32>
    %53 = tpu.matmul %50, %52, %cst_36 {dimension_numbers = #tpu.dot_dimension_numbers<[1], [0], [0], [1], [0, 0, 1, 1], [], []>} : vector<192x16xbf16>, vector<16x16xbf16>, vector<192x16xf32> -> vector<192x16xf32>
    %54 = arith.addf %43, %53 : vector<192x16xf32>
    %c1_i32_37 = arith.constant 1 : i32
    %55 = arith.addi %0, %c1_i32_37 : i32
    %c24_i32_38 = arith.constant 24 : i32
    %56 = arith.muli %55, %c24_i32_38 : i32
    %57 = tpu.assume_multiple %56, 8 : i32
    %c0_39 = arith.constant 0 : index
    %c0_40 = arith.constant 0 : index
    %58 = arith.index_cast %57 : i32 to index
    %c0_41 = arith.constant 0 : index
    %59 = vector.load %arg2[%c0_39, %c0_40, %58, %c0_41] : memref<1x1x456x16xbf16, #tpu.memory_space<vmem>>, vector<1x1x200x16xbf16>
    %60 = vector.shape_cast %59 : vector<1x1x200x16xbf16> to vector<200x16xbf16>
    %61 = vector.extract_strided_slice %60 {offsets = [2, 0], sizes = [192, 16], strides = [1, 1]} : vector<200x16xbf16> to vector<192x16xbf16>
    %c5 = arith.constant 5 : index
    %c0_42 = arith.constant 0 : index
    %c0_43 = arith.constant 0 : index
    %62 = vector.load %arg3[%c5, %c0_42, %c0_43] : memref<9x16x16xbf16, #tpu.memory_space<vmem>>, vector<1x16x16xbf16>
    %63 = vector.shape_cast %62 : vector<1x16x16xbf16> to vector<16x16xbf16>
    %cst_44 = arith.constant dense<0.000000e+00> : vector<192x16xf32>
    %64 = tpu.matmul %61, %63, %cst_44 {dimension_numbers = #tpu.dot_dimension_numbers<[1], [0], [0], [1], [0, 0, 1, 1], [], []>} : vector<192x16xbf16>, vector<16x16xbf16>, vector<192x16xf32> -> vector<192x16xf32>
    %65 = arith.addf %54, %64 : vector<192x16xf32>
    %c2_i32 = arith.constant 2 : i32
    %66 = arith.addi %0, %c2_i32 : i32
    %c24_i32_45 = arith.constant 24 : i32
    %67 = arith.muli %66, %c24_i32_45 : i32
    %68 = tpu.assume_multiple %67, 8 : i32
    %c0_46 = arith.constant 0 : index
    %c0_47 = arith.constant 0 : index
    %69 = arith.index_cast %68 : i32 to index
    %c0_48 = arith.constant 0 : index
    %70 = vector.load %arg2[%c0_46, %c0_47, %69, %c0_48] : memref<1x1x456x16xbf16, #tpu.memory_space<vmem>>, vector<1x1x192x16xbf16>
    %71 = vector.shape_cast %70 : vector<1x1x192x16xbf16> to vector<192x16xbf16>
    %c6 = arith.constant 6 : index
    %c0_49 = arith.constant 0 : index
    %c0_50 = arith.constant 0 : index
    %72 = vector.load %arg3[%c6, %c0_49, %c0_50] : memref<9x16x16xbf16, #tpu.memory_space<vmem>>, vector<1x16x16xbf16>
    %73 = vector.shape_cast %72 : vector<1x16x16xbf16> to vector<16x16xbf16>
    %cst_51 = arith.constant dense<0.000000e+00> : vector<192x16xf32>
    %74 = tpu.matmul %71, %73, %cst_51 {dimension_numbers = #tpu.dot_dimension_numbers<[1], [0], [0], [1], [0, 0, 1, 1], [], []>} : vector<192x16xbf16>, vector<16x16xbf16>, vector<192x16xf32> -> vector<192x16xf32>
    %75 = arith.addf %65, %74 : vector<192x16xf32>
    %c2_i32_52 = arith.constant 2 : i32
    %76 = arith.addi %0, %c2_i32_52 : i32
    %c24_i32_53 = arith.constant 24 : i32
    %77 = arith.muli %76, %c24_i32_53 : i32
    %78 = tpu.assume_multiple %77, 8 : i32
    %c0_54 = arith.constant 0 : index
    %c0_55 = arith.constant 0 : index
    %79 = arith.index_cast %78 : i32 to index
    %c0_56 = arith.constant 0 : index
    %80 = vector.load %arg2[%c0_54, %c0_55, %79, %c0_56] : memref<1x1x456x16xbf16, #tpu.memory_space<vmem>>, vector<1x1x200x16xbf16>
    %81 = vector.shape_cast %80 : vector<1x1x200x16xbf16> to vector<200x16xbf16>
    %82 = vector.extract_strided_slice %81 {offsets = [1, 0], sizes = [192, 16], strides = [1, 1]} : vector<200x16xbf16> to vector<192x16xbf16>
    %c7 = arith.constant 7 : index
    %c0_57 = arith.constant 0 : index
    %c0_58 = arith.constant 0 : index
    %83 = vector.load %arg3[%c7, %c0_57, %c0_58] : memref<9x16x16xbf16, #tpu.memory_space<vmem>>, vector<1x16x16xbf16>
    %84 = vector.shape_cast %83 : vector<1x16x16xbf16> to vector<16x16xbf16>
    %cst_59 = arith.constant dense<0.000000e+00> : vector<192x16xf32>
    %85 = tpu.matmul %82, %84, %cst_59 {dimension_numbers = #tpu.dot_dimension_numbers<[1], [0], [0], [1], [0, 0, 1, 1], [], []>} : vector<192x16xbf16>, vector<16x16xbf16>, vector<192x16xf32> -> vector<192x16xf32>
    %86 = arith.addf %75, %85 : vector<192x16xf32>
    %c2_i32_60 = arith.constant 2 : i32
    %87 = arith.addi %0, %c2_i32_60 : i32
    %c24_i32_61 = arith.constant 24 : i32
    %88 = arith.muli %87, %c24_i32_61 : i32
    %89 = tpu.assume_multiple %88, 8 : i32
    %c0_62 = arith.constant 0 : index
    %c0_63 = arith.constant 0 : index
    %90 = arith.index_cast %89 : i32 to index
    %c0_64 = arith.constant 0 : index
    %91 = vector.load %arg2[%c0_62, %c0_63, %90, %c0_64] : memref<1x1x456x16xbf16, #tpu.memory_space<vmem>>, vector<1x1x200x16xbf16>
    %92 = vector.shape_cast %91 : vector<1x1x200x16xbf16> to vector<200x16xbf16>
    %93 = vector.extract_strided_slice %92 {offsets = [2, 0], sizes = [192, 16], strides = [1, 1]} : vector<200x16xbf16> to vector<192x16xbf16>
    %c8 = arith.constant 8 : index
    %c0_65 = arith.constant 0 : index
    %c0_66 = arith.constant 0 : index
    %94 = vector.load %arg3[%c8, %c0_65, %c0_66] : memref<9x16x16xbf16, #tpu.memory_space<vmem>>, vector<1x16x16xbf16>
    %95 = vector.shape_cast %94 : vector<1x16x16xbf16> to vector<16x16xbf16>
    %cst_67 = arith.constant dense<0.000000e+00> : vector<192x16xf32>
    %96 = tpu.matmul %93, %95, %cst_67 {dimension_numbers = #tpu.dot_dimension_numbers<[1], [0], [0], [1], [0, 0, 1, 1], [], []>} : vector<192x16xbf16>, vector<16x16xbf16>, vector<192x16xf32> -> vector<192x16xf32>
    %97 = arith.addf %86, %96 : vector<192x16xf32>
    %c0_68 = arith.constant 0 : index
    %c0_69 = arith.constant 0 : index
    %98 = vector.load %arg4[%c0_68, %c0_69] : memref<2x16xf32, #tpu.memory_space<vmem>>, vector<1x16xf32>
    %99 = vector.broadcast %98 : vector<1x16xf32> to vector<192x16xf32>
    %100 = arith.mulf %97, %99 : vector<192x16xf32>
    %c1_70 = arith.constant 1 : index
    %c0_71 = arith.constant 0 : index
    %101 = vector.load %arg4[%c1_70, %c0_71] : memref<2x16xf32, #tpu.memory_space<vmem>>, vector<1x16xf32>
    %102 = vector.broadcast %101 : vector<1x16xf32> to vector<192x16xf32>
    %103 = arith.addf %100, %102 : vector<192x16xf32>
    %cst_72 = arith.constant 0.000000e+00 : f32
    %104 = vector.broadcast %cst_72 : f32 to vector<192x16xf32>
    %105 = arith.maximumf %103, %104 : vector<192x16xf32>
    %106 = vector.shape_cast %105 : vector<192x16xf32> to vector<8x24x16xf32>
    %107 = vector.extract_strided_slice %106 {offsets = [0, 0, 0], sizes = [8, 16, 16], strides = [1, 1, 1]} : vector<8x24x16xf32> to vector<8x16x16xf32>
    %108 = arith.truncf %107 : vector<8x16x16xf32> to vector<8x16x16xbf16>
    %c0_73 = arith.constant 0 : index
    %c0_74 = arith.constant 0 : index
    %c0_75 = arith.constant 0 : index
    %c0_76 = arith.constant 0 : index
    %109 = vector.load %arg5[%c0_73, %c0_74, %c0_75, %c0_76] : memref<1x8x16x16xbf16, #tpu.memory_space<vmem>>, vector<1x8x16x16xbf16>
    %110 = vector.shape_cast %109 : vector<1x8x16x16xbf16> to vector<8x16x16xbf16>
    %111 = vector.shape_cast %108 : vector<8x16x16xbf16> to vector<1x8x16x16xbf16>
    tpu.vector_store %arg5[%c0_73, %c0_74, %c0_75, %c0_76], %111 {strides = array<i32>} : memref<1x8x16x16xbf16, #tpu.memory_space<vmem>>, vector<1x8x16x16xbf16>,
    return
  }
  func.func @transform_0(%arg0: i32, %arg1: i32) -> (i32, i32, i32, i32) {
    %c0_i32 = arith.constant 0 : i32
    %c0_i32_0 = arith.constant 0 : i32
    %c0_i32_1 = arith.constant 0 : i32
    %c0_i32_2 = arith.constant 0 : i32
    return %arg0, %c0_i32, %c0_i32_0, %c0_i32_1 : i32, i32, i32, i32
  }
  func.func @transform_1(%arg0: i32, %arg1: i32) -> (i32, i32, i32) {
    %c0_i32 = arith.constant 0 : i32
    %c0_i32_0 = arith.constant 0 : i32
    %c0_i32_1 = arith.constant 0 : i32
    %c0_i32_2 = arith.constant 0 : i32
    return %c0_i32, %c0_i32_0, %c0_i32_1 : i32, i32, i32
  }
  func.func @transform_2(%arg0: i32, %arg1: i32) -> (i32, i32) {
    %c0_i32 = arith.constant 0 : i32
    %c0_i32_0 = arith.constant 0 : i32
    %c0_i32_1 = arith.constant 0 : i32
    return %c0_i32, %c0_i32_0 : i32, i32
  }
  func.func @transform_3(%arg0: i32, %arg1: i32) -> (i32, i32, i32, i32) {
    %c0_i32 = arith.constant 0 : i32
    %c0_i32_0 = arith.constant 0 : i32
    %c0_i32_1 = arith.constant 0 : i32
    return %arg0, %arg1, %c0_i32, %c0_i32_0 : i32, i32, i32, i32
  }
}

module attributes {stable_mosaic.version = 11 : i64} {
  func.func @kernel(%arg0: i32, %arg1: memref<128x16xbf16, #tpu.memory_space<vmem>>, %arg2: memref<16x64xbf16, #tpu.memory_space<vmem>>, %arg3: memref<2x64xf32, #tpu.memory_space<vmem>>, %arg4: memref<128x64xbf16, #tpu.memory_space<vmem>>, %arg5: memref<128x64xbf16, #tpu.memory_space<vmem>>) attributes {dimension_semantics = [#tpu.dimension_semantics<parallel>], iteration_bounds = array<i64: 4>, scalar_prefetch = 0 : i64, scratch_operands = 0 : i64, tpu.core_type = #tpu.core_type<tc>, window_params = [{transform_indices = @transform_0, window_bounds = array<i64: 128, 16>}, {pipeline_mode = #tpu.pipeline_mode<synchronous>, transform_indices = @transform_1, window_bounds = array<i64: 16, 64>}, {pipeline_mode = #tpu.pipeline_mode<synchronous>, transform_indices = @transform_2, window_bounds = array<i64: 2, 64>}, {transform_indices = @transform_3, window_bounds = array<i64: 128, 64>}, {transform_indices = @transform_4, window_bounds = array<i64: 128, 64>}]} {
    %c0 = arith.constant 0 : index
    %c0_0 = arith.constant 0 : index
    %0 = vector.load %arg1[%c0, %c0_0] : memref<128x16xbf16, #tpu.memory_space<vmem>>, vector<128x16xbf16>
    %c0_1 = arith.constant 0 : index
    %c0_2 = arith.constant 0 : index
    %1 = vector.load %arg2[%c0_1, %c0_2] : memref<16x64xbf16, #tpu.memory_space<vmem>>, vector<16x64xbf16>
    %cst = arith.constant dense<0.000000e+00> : vector<128x64xf32>
    %2 = tpu.matmul %0, %1, %cst {dimension_numbers = #tpu.dot_dimension_numbers<[1], [0], [0], [1], [0, 0, 1, 1], [], []>} : vector<128x16xbf16>, vector<16x64xbf16>, vector<128x64xf32> -> vector<128x64xf32>
    %c0_3 = arith.constant 0 : index
    %c0_4 = arith.constant 0 : index
    %3 = vector.load %arg3[%c0_3, %c0_4] : memref<2x64xf32, #tpu.memory_space<vmem>>, vector<1x64xf32>
    %4 = vector.broadcast %3 : vector<1x64xf32> to vector<128x64xf32>
    %5 = arith.mulf %2, %4 : vector<128x64xf32>
    %c1 = arith.constant 1 : index
    %c0_5 = arith.constant 0 : index
    %6 = vector.load %arg3[%c1, %c0_5] : memref<2x64xf32, #tpu.memory_space<vmem>>, vector<1x64xf32>
    %7 = vector.broadcast %6 : vector<1x64xf32> to vector<128x64xf32>
    %8 = arith.addf %5, %7 : vector<128x64xf32>
    %c0_6 = arith.constant 0 : index
    %c0_7 = arith.constant 0 : index
    %9 = vector.load %arg4[%c0_6, %c0_7] : memref<128x64xbf16, #tpu.memory_space<vmem>>, vector<128x64xbf16>
    %10 = arith.extf %9 : vector<128x64xbf16> to vector<128x64xf32>
    %11 = arith.addf %8, %10 : vector<128x64xf32>
    %cst_8 = arith.constant 0.000000e+00 : f32
    %12 = vector.broadcast %cst_8 : f32 to vector<128x64xf32>
    %13 = arith.maximumf %11, %12 : vector<128x64xf32>
    %14 = arith.truncf %13 : vector<128x64xf32> to vector<128x64xbf16>
    %c0_9 = arith.constant 0 : index
    %c0_10 = arith.constant 0 : index
    %15 = vector.load %arg5[%c0_9, %c0_10] : memref<128x64xbf16, #tpu.memory_space<vmem>>, vector<128x64xbf16>
    tpu.vector_store %arg5[%c0_9, %c0_10], %14 {strides = array<i32>} : memref<128x64xbf16, #tpu.memory_space<vmem>>, vector<128x64xbf16>,
    return
  }
  func.func @transform_0(%arg0: i32) -> (i32, i32) {
    %c0_i32 = arith.constant 0 : i32
    %c0_i32_0 = arith.constant 0 : i32
    return %arg0, %c0_i32 : i32, i32
  }
  func.func @transform_1(%arg0: i32) -> (i32, i32) {
    %c0_i32 = arith.constant 0 : i32
    %c0_i32_0 = arith.constant 0 : i32
    %c0_i32_1 = arith.constant 0 : i32
    return %c0_i32, %c0_i32_0 : i32, i32
  }
  func.func @transform_2(%arg0: i32) -> (i32, i32) {
    %c0_i32 = arith.constant 0 : i32
    %c0_i32_0 = arith.constant 0 : i32
    %c0_i32_1 = arith.constant 0 : i32
    return %c0_i32, %c0_i32_0 : i32, i32
  }
  func.func @transform_3(%arg0: i32) -> (i32, i32) {
    %c0_i32 = arith.constant 0 : i32
    %c0_i32_0 = arith.constant 0 : i32
    return %arg0, %c0_i32 : i32, i32
  }
  func.func @transform_4(%arg0: i32) -> (i32, i32) {
    %c0_i32 = arith.constant 0 : i32
    %c0_i32_0 = arith.constant 0 : i32
    return %arg0, %c0_i32 : i32, i32
  }
}

</mosaic_0001>

<bundles_post_ra>
// kernel: bottleneck_forward.3
= control target key start
LH: loop header
LB: loop body
LE: loop exit
PB: predicated region body
PF: predicated region fallthrough
CT: control target
= control target key end

     0   :  { %s737_s12 = smov 0   ;;  %s857_s0 = inlined_call_operand.vmem [shape: bf16[512,64], index: 0, kind: input, shape index: {}]   ;;  %s858_s1 = inlined_call_operand.vmem [shape: bf16[64,16], index: 1, kind: input, shape index: {}]   ;;  %s859_s2 = inlined_call_operand.vmem [shape: f32[2,16], index: 2, kind: input, shape index: {}]   ;;  %s860_s3 = inlined_call_operand.vmem [shape: bf16[512,16], index: 3, kind: output, shape index: {}]  }
   0x1 LB: > { %s580_s13 = sadd.s32 4294967295, %s715_s12   ;;  %p584_p0 = scmp.ge.s32.totalorder %s715_s12, 1  ;;  %s715_s12 = sphi %s737_s12, %s13_s12  }
   0x2   : > { %p138_p1 = scmp.lt.s32.totalorder %s715_s12, 5 }
   0x4   : > { %p139_p2 = pnand %p584_p0, %p138_p1 }
   0x5   : > { %v697_v0 = vld [vmem:[%s858_s1] sm:$0xff] (!%p139_p2)   ;;  %s585_s16 = sshll.u32 (!%p139_p2), %s580_s13, 4  ;;  %v698_v1 = vld [vmem:[%s858_s1 + $0x8] sm:$0xff] (!%p139_p2)   ;;  %v699_v2 = vld [vmem:[%s858_s1 + $0x10] sm:$0xff] (!%p139_p2)   ;;  %vm263_vm0 = vcmask (!%p139_p2), 523264   ;;  %vm507_vm1 = vcmask (!%p139_p2), 125952  }
   0x6   : > { %142 = sbr.rel (%p139_p2) target bundleno = 255 (0xff), region = 32  ;;  %p163_p3 = scmp.lt.s32.totalorder (!%p139_p2), %s585_s16, 63  ;;  %657 = vmatprep.subr.bf16.mxu0 (!%p139_p2), %v697_v0  ;;  %681 = vmatprep.subr.bf16.mxu1 (!%p139_p2), %v697_v0  ;;  %v700_v3 = vld [vmem:[%s858_s1 + $0x18] sm:$0xff] (!%p139_p2)   ;;  %v776_v12 = vld [vmem:[%s859_s2] ss:$0 sm:$0xff] (!%p139_p2) }
   0x7   : > { %658 = vmatpush3.bf16.msra.mxu0 (!%p139_p2), %v697_v0  ;;  %685 = vmatpush3.bf16.msra.mxu1 (!%p139_p2), %v697_v0  ;;  %v781_v14 = vld [vmem:[%s859_s2 + $0x1] ss:$0 sm:$0xff] (!%p139_p2) }
   0x8   : > { %659 = vmatprep.subr.bf16.mxu0 (!%p139_p2), %v698_v1  ;;  %682 = vmatprep.subr.bf16.mxu1 (!%p139_p2), %v698_v1 }
   0xb   : > { %660 = vmatpush3.bf16.msra.mxu0 (!%p139_p2), %v698_v1  ;;  %686 = vmatpush3.bf16.msra.mxu1 (!%p139_p2), %v698_v1 }
   0xc   : > { %661 = vmatprep.subr.bf16.mxu0 (!%p139_p2), %v699_v2  ;;  %683 = vmatprep.subr.bf16.mxu1 (!%p139_p2), %v699_v2 }
   0xd   : > { %s862_s16 = smov (!%p163_p3, %s585_s16), 63 }
   0xe   : > { %s586_s21 = sshll.u32 %s862_s16, 2 }
   0xf   : > { %s166_s26 = scalar_lea.vmem %s857_s0, %s586_s21  ;;  %662 = vmatpush3.bf16.msra.mxu0 %v699_v2  ;;  %687 = vmatpush3.bf16.msra.mxu1 %v699_v2  ;;  %s802_s6 = scalar_lea.vmem %s860_s3, %s586_s21 }
  0x10   : > { %v701_v4 = vld [vmem:[%s166_s26] sm:$0xff]   ;;  %663 = vmatprep.subr.bf16.mxu0 %v700_v3  ;;  %684 = vmatprep.subr.bf16.mxu1 %v700_v3  ;;  %v703_v6 = vld [vmem:[%s166_s26 + $0x8] sm:$0xff]   ;;  %v705_v8 = vld [vmem:[%s166_s26 + $0x10] sm:$0xff]  }
  0x11   : > { %v702_v5 = vld [vmem:[%s166_s26 + $0x20] sm:$0xff]   ;;  %665 = vmatprep.mubr.msk.bf16.mxu0 %vm263_vm0, %v701_v4  ;;  %v704_v7 = vld [vmem:[%s166_s26 + $0x28] sm:$0xff]   ;;  %v706_v9 = vld [vmem:[%s166_s26 + $0x30] sm:$0xff]  }
  0x12   : > { %673 = vmatprep.mubr.msk.bf16.mxu1 %vm263_vm0, %v702_v5  ;;  %v707_v10 = vld [vmem:[%s166_s26 + $0x18] sm:$0xff]  }
  0x13   : > { %664 = vmatpush3.bf16.msra.mxu0 %v700_v3  ;;  %688 = vmatpush3.bf16.msra.mxu1 %v700_v3  ;;  %v708_v11 = vld [vmem:[%s166_s26 + $0x38] sm:$0xff]  }
  0x16   : > { %666 = vmatmul.mubr.msk.bf16.vlgmr.msra.gmra.mrb[0].mxu0 %vm263_vm0, %v703_v6  ;;  %674 = vmatmul.mubr.msk.bf16.vlgmr.msra.gmra.mrb[0].mxu1 %vm263_vm0, %v704_v7 }
  0x17   : > { %669 = vmatprep.mubr.msk.bf16.mxu0 %vm263_vm0, %v705_v8  ;;  %677 = vmatprep.mubr.msk.bf16.mxu1 %vm263_vm0, %v706_v9 }
  0x1e   : > { %670 = vmatmul.mubr.msk.bf16.gmra.mrb[4].mxu0 %vm263_vm0, %v707_v10  ;;  %678 = vmatmul.mubr.msk.bf16.gmra.mrb[4].mxu1 %vm263_vm0, %v708_v11 }
  0xe9   : > { %v667_v13 = vpop.f32.mrb[0].mxu0  ;;  %v675_v15 = vpop.f32.mrb[0].mxu1 }
  0xea   : > { %v392_v16 = vmul.f32 %v667_v13, %v776_v12  ;;  %v400_v17 = vmul.f32 %v675_v15, %v776_v12  ;;  %v322_v18 = vpop.f32.mrb[1].mxu0  ;;  %v354_v19 = vpop.f32.mrb[1].mxu1 }
  0xeb   : > { %v390_v20 = vmul.f32 %v776_v12, %v322_v18  ;;  %v398_v21 = vmul.f32 %v776_v12, %v354_v19  ;;  %v668_v22 = vpop.f32.mrb[2].mxu0  ;;  %v676_v23 = vpop.f32.mrb[2].mxu1 }
  0xec   : > { %v413_v24 = vadd.f32 %v781_v14, %v392_v16  ;;  %v421_v25 = vadd.f32 %v781_v14, %v400_v17  ;;  %v393_v26 = vmul.f32 %v668_v22, %v776_v12  ;;  %v401_v27 = vmul.f32 %v676_v23, %v776_v12  ;;  %v325_v28 = vpop.f32.mrb[3].mxu0  ;;  %v357_v29 = vpop.f32.mrb[3].mxu1 }
  0xed   : > { %v411_v30 = vadd.f32 %v781_v14, %v390_v20  ;;  %v419_v31 = vadd.f32 %v781_v14, %v398_v21  ;;  %v391_v32 = vmul.f32 %v776_v12, %v325_v28  ;;  %v399_v33 = vmul.f32 %v776_v12, %v357_v29 }
  0xee   : > { %v429_v34 = vmax.f32 %v413_v24, 0.0  ;;  %v437_v35 = vmax.f32 %v421_v25, 0.0  ;;  %v414_v36 = vadd.f32 %v781_v14, %v393_v26  ;;  %v422_v37 = vadd.f32 %v781_v14, %v401_v27 }
  0xef   : > { %v427_v38 = vmax.f32 %v411_v30, 0.0  ;;  %v435_v39 = vmax.f32 %v419_v31, 0.0  ;;  %v412_v40 = vadd.f32 %v781_v14, %v391_v32  ;;  %v420_v41 = vadd.f32 %v781_v14, %v399_v33 }
  0xf0   : > { %v631_v42 = vpack.c.bf16 %v429_v34, %v429_v34  ;;  %v639_v43 = vpack.c.bf16 %v437_v35, %v437_v35  ;;  %v430_v44 = vmax.f32 %v414_v36, 0.0  ;;  %v438_v45 = vmax.f32 %v422_v37, 0.0 }
  0xf1   : > { %v629_v46 = vpack.c.bf16 %v427_v38, %v427_v38  ;;  %v637_v47 = vpack.c.bf16 %v435_v39, %v435_v39  ;;  %v428_v48 = vmax.f32 %v412_v40, 0.0  ;;  %v436_v49 = vmax.f32 %v420_v41, 0.0  ;;  %v671_v50 = vpop.f32.mrb[4].mxu0  ;;  %v679_v51 = vpop.f32.mrb[4].mxu1 }
  0xf2   : > { %510 = vst.msk [vmem:[%s802_s6 + $0x8] sm:$0xf] %vm507_vm1, %v631_v42  ;;  %518 = vst.msk [vmem:[%s802_s6 + $0x28] sm:$0xf] %vm507_vm1, %v639_v43  ;;  %v632_v52 = vpack.c.bf16 %v430_v44, %v430_v44  ;;  %v640_v53 = vpack.c.bf16 %v438_v45, %v438_v45  ;;  %v396_v54 = vmul.f32 %v671_v50, %v776_v12  ;;  %v338_v56 = vpop.f32.mrb[5].mxu0  ;;  %v370_v57 = vpop.f32.mrb[5].mxu1 }
  0xf3   : > { %v404_v55 = vmul.f32 %v679_v51, %v776_v12  ;;  %508 = vst.msk [vmem:[%s802_s6] sm:$0xf] %vm507_vm1, %v629_v46  ;;  %516 = vst.msk [vmem:[%s802_s6 + $0x20] sm:$0xf] %vm507_vm1, %v637_v47  ;;  %v630_v58 = vpack.c.bf16 %v428_v48, %v428_v48  ;;  %v638_v59 = vpack.c.bf16 %v436_v49, %v436_v49  ;;  %v672_v62 = vpop.f32.mrb[6].mxu0  ;;  %v680_v63 = vpop.f32.mrb[6].mxu1 }
  0xf4   : > { %v394_v60 = vmul.f32 %v776_v12, %v338_v56  ;;  %v402_v61 = vmul.f32 %v776_v12, %v370_v57  ;;  %511 = vst.msk [vmem:[%s802_s6 + $0xc] sm:$0xf] %vm507_vm1, %v632_v52  ;;  %519 = vst.msk [vmem:[%s802_s6 + $0x2c] sm:$0xf] %vm507_vm1, %v640_v53  ;;  %v417_v0 = vadd.f32 %v781_v14, %v396_v54  ;;  %v341_v4 = vpop.f32.mrb[7].mxu0  ;;  %v373_v5 = vpop.f32.mrb[7].mxu1 }
  0xf5   : > { %v425_v1 = vadd.f32 %v781_v14, %v404_v55  ;;  %v397_v2 = vmul.f32 %v672_v62, %v776_v12  ;;  %v405_v3 = vmul.f32 %v680_v63, %v776_v12  ;;  %509 = vst.msk [vmem:[%s802_s6 + $0x4] sm:$0xf] %vm507_vm1, %v630_v58  ;;  %517 = vst.msk [vmem:[%s802_s6 + $0x24] sm:$0xf] %vm507_vm1, %v638_v59 }
  0xf6   : > { %v415_v6 = vadd.f32 %v781_v14, %v394_v60  ;;  %v423_v7 = vadd.f32 %v781_v14, %v402_v61  ;;  %v395_v8 = vmul.f32 %v776_v12, %v341_v4  ;;  %v403_v9 = vmul.f32 %v776_v12, %v373_v5 }
  0xf7   : > { %v433_v10 = vmax.f32 %v417_v0, 0.0  ;;  %v441_v11 = vmax.f32 %v425_v1, 0.0  ;;  %v418_v13 = vadd.f32 %v781_v14, %v397_v2  ;;  %v426_v15 = vadd.f32 %v781_v14, %v405_v3 }
  0xf8   : > { %v431_v16 = vmax.f32 %v415_v6, 0.0  ;;  %v439_v17 = vmax.f32 %v423_v7, 0.0  ;;  %v416_v18 = vadd.f32 %v781_v14, %v395_v8  ;;  %v424_v19 = vadd.f32 %v781_v14, %v403_v9 }
  0xf9   : > { %v635_v20 = vpack.c.bf16 %v433_v10, %v433_v10  ;;  %v643_v21 = vpack.c.bf16 %v441_v11, %v441_v11  ;;  %v434_v12 = vmax.f32 %v418_v13, 0.0  ;;  %v442_v22 = vmax.f32 %v426_v15, 0.0 }
  0xfa   : > { %v633_v23 = vpack.c.bf16 %v431_v16, %v431_v16  ;;  %v641_v24 = vpack.c.bf16 %v439_v17, %v439_v17  ;;  %v432_v25 = vmax.f32 %v416_v18, 0.0  ;;  %v440_v26 = vmax.f32 %v424_v19, 0.0 }
  0xfb   : > { %514 = vst.msk [vmem:[%s802_s6 + $0x18] sm:$0xf] %vm507_vm1, %v635_v20  ;;  %522 = vst.msk [vmem:[%s802_s6 + $0x38] sm:$0xf] %vm507_vm1, %v643_v21  ;;  %v636_v27 = vpack.c.bf16 %v434_v12, %v434_v12  ;;  %v644_v28 = vpack.c.bf16 %v442_v22, %v442_v22 }
  0xfc   : > { %512 = vst.msk [vmem:[%s802_s6 + $0x10] sm:$0xf] %vm507_vm1, %v633_v23  ;;  %520 = vst.msk [vmem:[%s802_s6 + $0x30] sm:$0xf] %vm507_vm1, %v641_v24  ;;  %v634_v14 = vpack.c.bf16 %v432_v25, %v432_v25  ;;  %v642_v29 = vpack.c.bf16 %v440_v26, %v440_v26 }
  0xfd   : > { %515 = vst.msk [vmem:[%s802_s6 + $0x1c] sm:$0xf] %vm507_vm1, %v636_v27  ;;  %523 = vst.msk [vmem:[%s802_s6 + $0x3c] sm:$0xf] %vm507_vm1, %v644_v28 }
  0xfe   : > { %513 = vst.msk [vmem:[%s802_s6 + $0x14] sm:$0xf] %vm507_vm1, %v634_v14  ;;  %521 = vst.msk [vmem:[%s802_s6 + $0x34] sm:$0xf] %vm507_vm1, %v642_v29 }
  0xff PF: > { %s13_s12 = sadd.s32 1, %s715_s12  }
 0x100   : > { %p10_p4 = scmp.ge.s32.totalorder %s13_s12, 6  }
 0x102   :  { %12 = sbr.rel (!%p10_p4) target bundleno = 1 (0x1), region = 62 }

// kernel: bottleneck_forward.5
= control target key start
LH: loop header
LB: loop body
LE: loop exit
PB: predicated region body
PF: predicated region fallthrough
CT: control target
= control target key end

     0   :  { %s847_s15 = smov 0   ;;  %s995_s0 = inlined_call_operand.vmem [shape: bf16[512,16], index: 0, kind: input, shape index: {}]   ;;  %s996_s1 = inlined_call_operand.vmem [shape: bf16[16,64], index: 1, kind: input, shape index: {}]   ;;  %s997_s2 = inlined_call_operand.vmem [shape: f32[2,64], index: 2, kind: input, shape index: {}]   ;;  %s998_s3 = inlined_call_operand.vmem [shape: bf16[512,64], index: 3, kind: input, shape index: {}]   ;;  %s999_s4 = inlined_call_operand.vmem [shape: bf16[512,64], index: 4, kind: output, shape index: {}]  }
   0x1 LB: > { %s665_s16 = sadd.s32 4294967295, %s820_s15   ;;  %p669_p0 = scmp.ge.s32.totalorder %s820_s15, 1  ;;  %s820_s15 = sphi %s847_s15, %s14_s15  }
   0x2   : > { %p174_p1 = scmp.lt.s32.totalorder %s820_s15, 5 }
   0x4   : > { %p175_p2 = pnand %p669_p0, %p174_p1 }
   0x5   : > { %v805_v0 = vld [vmem:[%s996_s1] sm:$0xff] (!%p175_p2)   ;;  %s670_s19 = sshll.u32 (!%p175_p2), %s665_s16, 4  ;;  %vm288_vm0 = vcmask (!%p175_p2), 130048   ;;  %vm580_vm1 = vcmask (!%p175_p2), 519168  }
   0x6   : > { %178 = sbr.rel (%p175_p2) target bundleno = 256 (0x100), region = 36  ;;  %p206_p3 = scmp.lt.s32.totalorder (!%p175_p2), %s670_s19, 63  ;;  %777 = vmatprep.subr.bf16.mxu0 (!%p175_p2), %v805_v0  ;;  %795 = vmatprep.subr.bf16.mxu1 (!%p175_p2), %v805_v0  ;;  %v885_v15 = vld [vmem:[%s997_s2] ss:$0 sm:$0xff] (!%p175_p2)  ;;  %v895_v26 = vld [vmem:[%s997_s2 + $0x1] ss:$0 sm:$0xff] (!%p175_p2) }
   0x7   : > { %778 = vmatpush3.bf16.msra.mxu0 (!%p175_p2), %v805_v0  ;;  %796 = vmatpush3.bf16.msra.mxu1 (!%p175_p2), %v805_v0 }
   0xd   : > { %s1001_s19 = smov (!%p206_p3, %s670_s19), 63 }
   0xe   : > { %s858_s20 = sshll.u32 %s1001_s19, 2 }
   0xf   : > { %s209_s23 = scalar_lea.vmem %s995_s0, %s858_s20  ;;  %s215_s26 = scalar_lea.vmem %s998_s3, %s858_s20 }
  0x10   : > { %v806_v1 = vld [vmem:[%s209_s23] sm:$0xff]   ;;  %v808_v3 = vld [vmem:[%s209_s23 + $0x8] sm:$0xff]   ;;  %v810_v5 = vld [vmem:[%s209_s23 + $0x10] sm:$0xff]   ;;  %s926_s7 = scalar_lea.vmem %s999_s4, %s858_s20 }
  0x11   : > { %v807_v2 = vld [vmem:[%s209_s23 + $0x20] sm:$0xff]   ;;  %779 = vmatprep.mubr.msk.bf16.mxu0 %vm288_vm0, %v806_v1  ;;  %v809_v4 = vld [vmem:[%s209_s23 + $0x28] sm:$0xff]   ;;  %v811_v6 = vld [vmem:[%s209_s23 + $0x30] sm:$0xff]  }
  0x12   : > { %787 = vmatprep.mubr.msk.bf16.mxu1 %vm288_vm0, %v807_v2  ;;  %780 = vmatmul.mubr.msk.bf16.vlgmr.msra.gmra.mrb[0].mxu0 %vm288_vm0, %v808_v3  ;;  %v812_v7 = vld [vmem:[%s209_s23 + $0x18] sm:$0xff]   ;;  %v761_v9 = vld [vmem:[%s215_s26 + $0x8] sm:$0xff]   ;;  %v730_v11 = vld [vmem:[%s215_s26] sm:$0xff]  }
  0x13   : > { %788 = vmatmul.mubr.msk.bf16.vlgmr.msra.gmra.mrb[0].mxu1 %vm288_vm0, %v809_v4  ;;  %783 = vmatprep.mubr.msk.bf16.mxu0 %vm288_vm0, %v810_v5  ;;  %v813_v8 = vld [vmem:[%s209_s23 + $0x38] sm:$0xff]   ;;  %v765_v10 = vld [vmem:[%s215_s26 + $0x28] sm:$0xff]   ;;  %v876_v12 = vld [vmem:[%s215_s26 + $0x20] sm:$0xff]   ;;  %v735_v16 = vunpack.c.l.bf16 %v761_v9  ;;  %v731_v18 = vunpack.c.l.bf16 %v730_v11  ;;  %v736_v22 = vunpack.c.h.bf16 %v761_v9  ;;  %v732_v24 = vunpack.c.h.bf16 %v730_v11 }
  0x14   : > { %791 = vmatprep.mubr.msk.bf16.mxu1 %vm288_vm0, %v811_v6  ;;  %v878_v13 = vld [vmem:[%s215_s26 + $0x18] sm:$0xff]   ;;  %v751_v17 = vunpack.c.l.bf16 %v765_v10  ;;  %v887_v19 = vld [vmem:[%s215_s26 + $0x10] sm:$0xff]   ;;  %v747_v21 = vunpack.c.l.bf16 %v876_v12  ;;  %v752_v23 = vunpack.c.h.bf16 %v765_v10  ;;  %v748_v27 = vunpack.c.h.bf16 %v876_v12 }
  0x15   : > { %v880_v14 = vld [vmem:[%s215_s26 + $0x38] sm:$0xff]   ;;  %v889_v20 = vld [vmem:[%s215_s26 + $0x30] sm:$0xff]   ;;  %v743_v28 = vunpack.c.l.bf16 %v878_v13  ;;  %v739_v33 = vunpack.c.l.bf16 %v887_v19  ;;  %v744_v35 = vunpack.c.h.bf16 %v878_v13  ;;  %v740_v41 = vunpack.c.h.bf16 %v887_v19 }
  0x16   : > { %v759_v29 = vunpack.c.l.bf16 %v880_v14  ;;  %v755_v34 = vunpack.c.l.bf16 %v889_v20  ;;  %v760_v40 = vunpack.c.h.bf16 %v880_v14  ;;  %v756_v47 = vunpack.c.h.bf16 %v889_v20 }
  0x1a   : > { %784 = vmatmul.mubr.msk.bf16.gmra.mrb[4].mxu0 %vm288_vm0, %v812_v7 }
  0x1b   : > { %792 = vmatmul.mubr.msk.bf16.gmra.mrb[4].mxu1 %vm288_vm0, %v813_v8 }
  0xe5   : > { %v781_v25 = vpop.f32.mrb[0].mxu0 }
  0xe6   : > { %v417_v30 = vmul.f32 %v781_v25, %v885_v15  ;;  %v789_v31 = vpop.f32.mrb[0].mxu1  ;;  %v347_v32 = vpop.f32.mrb[1].mxu0 }
  0xe7   : > { %v425_v36 = vmul.f32 %v789_v31, %v885_v15  ;;  %v415_v37 = vmul.f32 %v885_v15, %v347_v32  ;;  %v379_v38 = vpop.f32.mrb[1].mxu1  ;;  %v782_v39 = vpop.f32.mrb[2].mxu0 }
  0xe8   : > { %v438_v42 = vadd.f32 %v895_v26, %v417_v30  ;;  %v423_v43 = vmul.f32 %v885_v15, %v379_v38  ;;  %v418_v44 = vmul.f32 %v782_v39, %v885_v15  ;;  %v790_v45 = vpop.f32.mrb[2].mxu1  ;;  %v350_v46 = vpop.f32.mrb[3].mxu0 }
  0xe9   : > { %v446_v48 = vadd.f32 %v895_v26, %v425_v36  ;;  %v436_v49 = vadd.f32 %v895_v26, %v415_v37  ;;  %v426_v50 = vmul.f32 %v790_v45, %v885_v15  ;;  %v416_v51 = vmul.f32 %v885_v15, %v350_v46  ;;  %v382_v52 = vpop.f32.mrb[3].mxu1 }
  0xea   : > { %v486_v53 = vadd.f32 %v735_v16, %v438_v42  ;;  %v444_v54 = vadd.f32 %v895_v26, %v423_v43  ;;  %v439_v55 = vadd.f32 %v895_v26, %v418_v44  ;;  %v424_v56 = vmul.f32 %v885_v15, %v382_v52 }
  0xeb   : > { %v494_v57 = vadd.f32 %v751_v17, %v446_v48  ;;  %v484_v58 = vadd.f32 %v731_v18, %v436_v49  ;;  %v447_v59 = vadd.f32 %v895_v26, %v426_v50  ;;  %v437_v60 = vadd.f32 %v895_v26, %v416_v51 }
  0xec   : > { %v502_v61 = vmax.f32 %v486_v53, 0.0  ;;  %v492_v62 = vadd.f32 %v747_v21, %v444_v54  ;;  %v487_v63 = vadd.f32 %v736_v22, %v439_v55  ;;  %v445_v0 = vadd.f32 %v895_v26, %v424_v56 }
  0xed   : > { %v510_v1 = vmax.f32 %v494_v57, 0.0  ;;  %v500_v2 = vmax.f32 %v484_v58, 0.0  ;;  %v495_v3 = vadd.f32 %v752_v23, %v447_v59  ;;  %v485_v4 = vadd.f32 %v732_v24, %v437_v60  ;;  %v785_v5 = vpop.f32.mrb[4].mxu0 }
  0xee   : > { %v715_v6 = vpack.c.bf16 %v502_v61, %v502_v61  ;;  %v508_v7 = vmax.f32 %v492_v62, 0.0  ;;  %v503_v8 = vmax.f32 %v487_v63, 0.0  ;;  %v493_v9 = vadd.f32 %v748_v27, %v445_v0  ;;  %v793_v10 = vpop.f32.mrb[4].mxu1  ;;  %v363_v11 = vpop.f32.mrb[5].mxu0 }
  0xef   : > { %v723_v12 = vpack.c.bf16 %v510_v1, %v510_v1  ;;  %v713_v16 = vpack.c.bf16 %v500_v2, %v500_v2  ;;  %v511_v17 = vmax.f32 %v495_v3, 0.0  ;;  %v501_v18 = vmax.f32 %v485_v4, 0.0  ;;  %v395_v21 = vpop.f32.mrb[5].mxu1  ;;  %v786_v22 = vpop.f32.mrb[6].mxu0 }
  0xf0   : > { %583 = vst.msk [vmem:[%s926_s7 + $0x8] sm:$0xf] %vm580_vm1, %v715_v6  ;;  %v721_v23 = vpack.c.bf16 %v508_v7, %v508_v7  ;;  %v716_v24 = vpack.c.bf16 %v503_v8, %v503_v8  ;;  %v509_v25 = vmax.f32 %v493_v9, 0.0  ;;  %v421_v30 = vmul.f32 %v785_v5, %v885_v15  ;;  %v794_v27 = vpop.f32.mrb[6].mxu1  ;;  %v366_v31 = vpop.f32.mrb[7].mxu0 }
  0xf1   : > { %591 = vst.msk [vmem:[%s926_s7 + $0x28] sm:$0xf] %vm580_vm1, %v723_v12  ;;  %581 = vst.msk [vmem:[%s926_s7] sm:$0xf] %vm580_vm1, %v713_v16  ;;  %v724_v32 = vpack.c.bf16 %v511_v17, %v511_v17  ;;  %v714_v36 = vpack.c.bf16 %v501_v18, %v501_v18  ;;  %v429_v37 = vmul.f32 %v793_v10, %v885_v15  ;;  %v398_v39 = vpop.f32.mrb[7].mxu1 }
  0xf2   : > { %v419_v38 = vmul.f32 %v885_v15, %v363_v11  ;;  %589 = vst.msk [vmem:[%s926_s7 + $0x20] sm:$0xf] %vm580_vm1, %v721_v23  ;;  %584 = vst.msk [vmem:[%s926_s7 + $0xc] sm:$0xf] %vm580_vm1, %v716_v24  ;;  %v722_v42 = vpack.c.bf16 %v509_v25, %v509_v25  ;;  %v442_v43 = vadd.f32 %v895_v26, %v421_v30 }
  0xf3   : > { %v427_v44 = vmul.f32 %v885_v15, %v395_v21  ;;  %v422_v45 = vmul.f32 %v786_v22, %v885_v15  ;;  %592 = vst.msk [vmem:[%s926_s7 + $0x2c] sm:$0xf] %vm580_vm1, %v724_v32  ;;  %582 = vst.msk [vmem:[%s926_s7 + $0x4] sm:$0xf] %vm580_vm1, %v714_v36  ;;  %v450_v46 = vadd.f32 %v895_v26, %v429_v37 }
  0xf4   : > { %v440_v48 = vadd.f32 %v895_v26, %v419_v38  ;;  %v430_v49 = vmul.f32 %v794_v27, %v885_v15  ;;  %v420_v50 = vmul.f32 %v885_v15, %v366_v31  ;;  %590 = vst.msk [vmem:[%s926_s7 + $0x24] sm:$0xf] %vm580_vm1, %v722_v42  ;;  %v490_v51 = vadd.f32 %v743_v28, %v442_v43 }
  0xf5   : > { %v448_v52 = vadd.f32 %v895_v26, %v427_v44  ;;  %v443_v53 = vadd.f32 %v895_v26, %v422_v45  ;;  %v428_v54 = vmul.f32 %v885_v15, %v398_v39  ;;  %v498_v55 = vadd.f32 %v759_v29, %v450_v46 }
  0xf6   : > { %v488_v56 = vadd.f32 %v739_v33, %v440_v48  ;;  %v451_v57 = vadd.f32 %v895_v26, %v430_v49  ;;  %v441_v58 = vadd.f32 %v895_v26, %v420_v50  ;;  %v506_v59 = vmax.f32 %v490_v51, 0.0 }
  0xf7   : > { %v496_v28 = vadd.f32 %v755_v34, %v448_v52  ;;  %v491_v60 = vadd.f32 %v744_v35, %v443_v53  ;;  %v449_v15 = vadd.f32 %v895_v26, %v428_v54  ;;  %v514_v61 = vmax.f32 %v498_v55, 0.0 }
  0xf8   : > { %v504_v29 = vmax.f32 %v488_v56, 0.0  ;;  %v499_v33 = vadd.f32 %v760_v40, %v451_v57  ;;  %v489_v62 = vadd.f32 %v740_v41, %v441_v58  ;;  %v719_v63 = vpack.c.bf16 %v506_v59, %v506_v59 }
  0xf9   : > { %v512_v0 = vmax.f32 %v496_v28, 0.0  ;;  %v507_v34 = vmax.f32 %v491_v60, 0.0  ;;  %v497_v13 = vadd.f32 %v756_v47, %v449_v15  ;;  %v727_v26 = vpack.c.bf16 %v514_v61, %v514_v61 }
  0xfa   : > { %v717_v35 = vpack.c.bf16 %v504_v29, %v504_v29  ;;  %v515_v1 = vmax.f32 %v499_v33, 0.0  ;;  %v505_v14 = vmax.f32 %v489_v62, 0.0  ;;  %587 = vst.msk [vmem:[%s926_s7 + $0x18] sm:$0xf] %vm580_vm1, %v719_v63 }
  0xfb   : > { %v725_v40 = vpack.c.bf16 %v512_v0, %v512_v0  ;;  %v720_v19 = vpack.c.bf16 %v507_v34, %v507_v34  ;;  %v513_v41 = vmax.f32 %v497_v13, 0.0  ;;  %595 = vst.msk [vmem:[%s926_s7 + $0x38] sm:$0xf] %vm580_vm1, %v727_v26 }
  0xfc   : > { %585 = vst.msk [vmem:[%s926_s7 + $0x10] sm:$0xf] %vm580_vm1, %v717_v35  ;;  %v728_v2 = vpack.c.bf16 %v515_v1, %v515_v1  ;;  %v718_v3 = vpack.c.bf16 %v505_v14, %v505_v14 }
  0xfd   : > { %593 = vst.msk [vmem:[%s926_s7 + $0x30] sm:$0xf] %vm580_vm1, %v725_v40  ;;  %588 = vst.msk [vmem:[%s926_s7 + $0x1c] sm:$0xf] %vm580_vm1, %v720_v19  ;;  %v726_v20 = vpack.c.bf16 %v513_v41, %v513_v41 }
  0xfe   : > { %596 = vst.msk [vmem:[%s926_s7 + $0x3c] sm:$0xf] %vm580_vm1, %v728_v2  ;;  %586 = vst.msk [vmem:[%s926_s7 + $0x14] sm:$0xf] %vm580_vm1, %v718_v3 }
  0xff   : > { %594 = vst.msk [vmem:[%s926_s7 + $0x34] sm:$0xf] %vm580_vm1, %v726_v20 }
 0x100 PF: > { %s14_s15 = sadd.s32 1, %s820_s15  }
 0x101   : > { %p11_p4 = scmp.ge.s32.totalorder %s14_s15, 6  }
 0x103   :  { %13 = sbr.rel (!%p11_p4) target bundleno = 1 (0x1), region = 69 }

// kernel: bottleneck_forward.4
= control target key start
LH: loop header
LB: loop body
LE: loop exit
PB: predicated region body
PF: predicated region fallthrough
CT: control target
= control target key end

     0   :  { %s3810_s12 = smov 0   ;;  %s3812_s13 = smov 0   ;;  %s4489_s0 = inlined_call_operand.vmem [shape: bf16[2,1,456,16], index: 0, kind: input, shape index: {}]   ;;  %s4490_s1 = inlined_call_operand.vmem [shape: bf16[9,16,16], index: 1, kind: input, shape index: {}]   ;;  %s4491_s2 = inlined_call_operand.vmem [shape: f32[2,16], index: 2, kind: input, shape index: {}]   ;;  %s4492_s3 = inlined_call_operand.vmem [shape: bf16[2,16,16,16], index: 3, kind: output, shape index: {}]  }
   0x1   :  { %s3814_s14 = smov 0   ;;  %s3816_s15 = smov 0  }
   0x2   :  { %s3818_s16 = smov 0  }
   0x3 LB: > { %s22_s17 = sadd.s32 1, %s3780_s14  ;;  %s25_s18 = sadd.s32 1, %s3784_s15  ;;  %s3788_s16 = sphi %s3818_s16, %s13_s16   ;;  %s3784_s15 = sphi %s3816_s15, %s4496_s15   ;;  %s3780_s14 = sphi %s3814_s14, %s4495_s14   ;;  %s3776_s13 = sphi %s3812_s13, %s4494_s13   ;;  %s3772_s12 = sphi %s3810_s12, %s4493_s12  }
   0x4   : > { %p23_p0 = scmp.ge.s32.totalorder %s22_s17, 2  ;;  %p2857_p1 = scmp.ge.s32.totalorder %s3788_s16, 1 }
   0x5   : > { %p151_p2 = scmp.lt.s32.totalorder %s3788_s16, 5 }
   0x6   : > { %s4498_s17 = smov (%p23_p0, %s22_s17), 0  ;;  %s4500_s18 = smov (!%p23_p0, %s25_s18), %s3784_s15 }
   0x7   : > { %p152_p3 = pnand %p2857_p1, %p151_p2  ;;  %p27_p4 = scmp.ge.s32.totalorder %s4500_s18, 2 }
   0x8   : > { %v3677_v0 = vld [vmem:[%s4490_s1 + $0x8] sm:$0xff] (!%p152_p3)   ;;  %p180_p5 = scmp.lt.s32.totalorder (!%p152_p3), %s3776_s13, 1  ;;  %v3848_v1 = vld [vmem:[%s4490_s1 + $0x20] sm:$0xff] (!%p152_p3)   ;;  %s3851_s23 = sshll.u32 (!%p152_p3), %s3772_s12, 3  ;;  %vm296_vm0 = vsmask.f32 (!%p152_p3), 7424 }
   0x9   : > { %s4502_s18 = smov (%p27_p4, %s4500_s18), 0  ;;  %155 = sbr.rel (%p152_p3) target bundleno = 466 (0x1d2), region = 32 }
   0xa   : > { %3216 = vmatprep.subr.bf16.mxu1 (!%p152_p3), %v3677_v0  ;;  %3320 = vmatprep.subr.bf16.mxu0 (!%p152_p3), %v3848_v1  ;;  %s198_s24 = smul.u32 (!%p152_p3), 192, %s3772_s12  ;;  %s920_s25 = sadd.s32 (!%p152_p3), 1, %s3851_s23  ;;  %v3681_v2 = vld [vmem:[%s4490_s1] sm:$0xff] (!%p152_p3)   ;;  %v3864_v3 = vld [vmem:[%s4490_s1 + $0x28] sm:$0xff] (!%p152_p3)   ;;  %vm403_vm1 = vcmask (!%p152_p3), 130048   ;;  %v3914_v27 = vld [vmem:[%s4490_s1 + $0x10] sm:$0xff] (!%p152_p3)  }
   0xb   : > { %3217 = vmatpush3.bf16.msra.mxu1 (!%p152_p3), %v3677_v0  ;;  %3321 = vmatpush3.bf16.msra.mxu0 (!%p152_p3), %v3848_v1  ;;  %s921_s5 = smul.u32 (!%p152_p3), 24, %s920_s25  ;;  %v3930_v37 = vld [vmem:[%s4490_s1 + $0x30] sm:$0xff] (!%p152_p3)   ;;  %s1769_s25 = sadd.s32 (!%p152_p3), 2, %s3851_s23  ;;  %vm715_vm2 = vcmask (!%p152_p3), 1046528   ;;  %vm2740_vm3 = vcmask (!%p152_p3), 125952  }
   0xc   : > { %s199_s4 = sshra.s32 (!%p152_p3), %s198_s24, 3  ;;  %3242 = vmatprep.subr.bf16.mxu1 (!%p152_p3), %v3681_v2  ;;  %3346 = vmatprep.subr.bf16.mxu0 (!%p152_p3), %v3864_v3  ;;  %s1770_s26 = smul.u32 (!%p152_p3), 24, %s1769_s25 }
   0xd   : > { %s2864_s9 = sshll.u32 (!%p152_p3), %s199_s4, 2  ;;  %s922_s11 = sshra.s32 (!%p152_p3), %s921_s5, 3 }
   0xe   : > { %s2921_s12 = sshll.u32 (!%p152_p3), %s922_s11, 2  ;;  %s1771_s27 = sshra.s32 (!%p152_p3), %s1770_s26, 3 }
   0xf   : > { %s2992_s28 = sshll.u32 (!%p152_p3), %s1771_s27, 2  ;;  %p188_p6 = scmp.lt.s32.totalorder (!%p152_p3), %s3851_s23, 15 }
  0x10   : > { %s4504_s13 = smov (!%p180_p5, %s3776_s13), 1 }
  0x11   : > { %s3636_s30 = smul.u32 228, %s4504_s13  ;;  %s4506_s23 = smov (!%p188_p6, %s3851_s23), 15 }
  0x12   : > { %s2860_s11 = sshll.u32 %s4506_s23, 1 }
  0x13   : > { %s3872_s8 = scalar_lea.vmem %s4489_s0, %s3636_s30 }
  0x14   : > { %s3875_s10 = scalar_lea.vmem %s3872_s8, %s2864_s9  ;;  %s3884_s19 = scalar_lea.vmem %s3872_s8, %s2921_s12 }
  0x15   : > { %v3878_v4 = vld [vmem:[%s3875_s10] sm:$0xff]   ;;  %v3881_v5 = vld [vmem:[%s3875_s10 + $0x8] sm:$0xff]   ;;  %v3894_v11 = vld [vmem:[%s3875_s10 + $0x10] sm:$0xff]   ;;  %s4020_s29 = scalar_lea.vmem %s3872_s8, %s2992_s28  ;;  %s2861_s12 = sshll.u32 %s4504_s13, 5 }
  0x16   : > { %v298_v6 = vshrl.u32 %v3878_v4, 16  ;;  %v300_v7 = vshll.u32 %v3878_v4, 16  ;;  %v305_v8 = vshll.u32 %v3881_v5, 16  ;;  %v309_v9 = vshrl.u32 %v3881_v5, 16  ;;  %v3891_v10 = vld [vmem:[%s3884_s19] sm:$0xff]   ;;  %v3897_v12 = vld [vmem:[%s3884_s19 + $0x8] sm:$0xff]   ;;  %s192_s21 = sadd.s32 %s2861_s12, %s2860_s11 }
  0x17   : > { %v1284_v15 = vshrl.u32 %v3891_v10, 16  ;;  %v1286_v16 = vshll.u32 %v3891_v10, 16  ;;  %v1291_v17 = vshll.u32 %v3897_v12, 16  ;;  %v1295_v18 = vshrl.u32 %v3897_v12, 16  ;;  %v3905_v22 = vld [vmem:[%s3884_s19 + $0x10] sm:$0xff]   ;;  %v3908_v25 = vld [vmem:[%s3875_s10 + $0x18] sm:$0xff]  }
  0x18   : > { %v302_v13 = vrot.slane %v300_v7, 1  ;;  %v307_v14 = vrot.slane %v305_v8, 1  ;;  %v313_v21 = vshll.u32 %v3894_v11, 16  ;;  %v317_v26 = vshrl.u32 %v3894_v11, 16  ;;  %v3921_v34 = vld [vmem:[%s3884_s19 + $0x18] sm:$0xff]   ;;  %v3925_v36 = vld [vmem:[%s3875_s10 + $0x20] sm:$0xff]  }
  0x19   : > { %v1288_v23 = vrot.slane %v1286_v16, 1  ;;  %v1293_v24 = vrot.slane %v1291_v17, 1  ;;  %v1299_v30 = vshll.u32 %v3905_v22, 16  ;;  %v321_v33 = vshll.u32 %v3908_v25, 16  ;;  %v3939_v46 = vld [vmem:[%s3884_s19 + $0x20] sm:$0xff]   ;;  %v3945_v50 = vld [vmem:[%s3875_s10 + $0x28] sm:$0xff]  }
  0x1a   : > { %v303_v19 = vor.u32 %v302_v13, %v298_v6  ;;  %v311_v20 = vor.u32 %v309_v9, %v307_v14  ;;  %v315_v29 = vrot.slane %v313_v21, 1  ;;  %v1303_v35 = vshrl.u32 %v3905_v22, 16  ;;  %v3956_v58 = vld [vmem:[%s3884_s19 + $0x28] sm:$0xff]   ;;  %v3960_v60 = vld [vmem:[%s3875_s10 + $0x30] sm:$0xff]   ;;  %v3972_v9 = vld [vmem:[%s3875_s10 + $0x38] sm:$0xff]   ;;  %s2862_s13 = sshll.u32 %s192_s21, 2 }
  0x1b   : > { %v1289_v31 = vor.u32 %v1288_v23, %v1284_v15  ;;  %v1297_v32 = vor.u32 %v1295_v18, %v1293_v24  ;;  %v1301_v39 = vrot.slane %v1299_v30, 1  ;;  %v325_v41 = vshrl.u32 %v3908_v25, 16  ;;  %s4414_s26 = scalar_lea.vmem %s4492_s3, %s2862_s13 }
  0x1c   : > { %v308_v28 = vsel %vm296_vm0, %v303_v19, %v307_v14  ;;  %v316_v38 = vsel %vm296_vm0, %v311_v20, %v315_v29  ;;  %v319_v40 = vor.u32 %v317_v26, %v315_v29  ;;  %v323_v43 = vrot.slane %v321_v33, 1 }
  0x1d   : > { %3218 = vmatprep.mubr.msk.bf16.mxu1 %vm403_vm1, %v308_v28  ;;  %v1294_v42 = vsel %vm296_vm0, %v1289_v31, %v1293_v24  ;;  %v1307_v44 = vshll.u32 %v3921_v34, 16  ;;  %v329_v45 = vshll.u32 %v3925_v36, 16  ;;  %v1302_v47 = vsel %vm296_vm0, %v1297_v32, %v1301_v39  ;;  %v3984_v24 = vld [vmem:[%s3875_s10 + $0x40] sm:$0xff]   ;;  %v3990_v31 = vld [vmem:[%s3875_s10 + $0x48] sm:$0xff]  }
  0x1e   : > { %3219 = vmatmul.mubr.msk.bf16.vlgmr.msra.gmra.mrb[0].mxu1 %vm403_vm1, %v316_v38  ;;  %3322 = vmatprep.mubr.msk.bf16.mxu0 %vm403_vm1, %v1294_v42  ;;  %v1305_v48 = vor.u32 %v1303_v35, %v1301_v39  ;;  %v1311_v49 = vshrl.u32 %v3921_v34, 16  ;;  %v324_v51 = vsel %vm296_vm0, %v319_v40, %v323_v43  ;;  %v327_v53 = vor.u32 %v325_v41, %v323_v43 }
  0x1f   : > { %3243 = vmatpush3.bf16.msra.mxu1 %v3681_v2  ;;  %3323 = vmatmul.mubr.msk.bf16.vlgmr.msra.gmra.mrb[0].mxu0 %vm403_vm1, %v1302_v47  ;;  %v1309_v52 = vrot.slane %v1307_v44, 1  ;;  %v331_v54 = vrot.slane %v329_v45, 1  ;;  %v1315_v55 = vshll.u32 %v3939_v46, 16  ;;  %v333_v56 = vshrl.u32 %v3925_v36, 16  ;;  %v3966_v2 = vld [vmem:[%s3884_s19 + $0x30] sm:$0xff]  }
  0x20   : > { %3268 = vmatprep.subr.bf16.mxu1 %v3914_v27  ;;  %3347 = vmatpush3.bf16.msra.mxu0 %v3864_v3  ;;  %v337_v57 = vshll.u32 %v3945_v50, 16  ;;  %v1319_v59 = vshrl.u32 %v3939_v46, 16  ;;  %v341_v0 = vshrl.u32 %v3945_v50, 16  ;;  %v1323_v8 = vshll.u32 %v3956_v58, 16  ;;  %v4008_v47 = vld [vmem:[%s3875_s10 + $0x50] sm:$0xff]  }
  0x21   : > { %3222 = vmatprep.mubr.msk.bf16.mxu1 %vm403_vm1, %v324_v51  ;;  %v1310_v61 = vsel %vm296_vm0, %v1305_v48, %v1309_v52  ;;  %v332_v62 = vsel %vm296_vm0, %v327_v53, %v331_v54  ;;  %v1313_v63 = vor.u32 %v1311_v49, %v1309_v52  ;;  %3372 = vmatprep.subr.bf16.mxu0 %v3930_v37  ;;  %v1317_v3 = vrot.slane %v1315_v55, 1  ;;  %v4012_v49 = vld [vmem:[%s3875_s10 + $0x58] sm:$0xff]  }
  0x22   : > { %3326 = vmatprep.mubr.msk.bf16.mxu0 %vm403_vm1, %v1310_v61  ;;  %v335_v6 = vor.u32 %v333_v56, %v331_v54  ;;  %v339_v7 = vrot.slane %v337_v57, 1  ;;  %v345_v13 = vshll.u32 %v3960_v60, 16  ;;  %v1327_v14 = vshrl.u32 %v3956_v58, 16 }
  0x23   : > { %v1331_v15 = vshll.u32 %v3966_v2, 16  ;;  %v349_v16 = vshrl.u32 %v3960_v60, 16  ;;  %v1318_v17 = vsel %vm296_vm0, %v1313_v63, %v1317_v3  ;;  %v1321_v19 = vor.u32 %v1319_v59, %v1317_v3  ;;  %v4034_v63 = vld [vmem:[%s3875_s10 + $0x60] ss:$0 sps:$4 sm:$0xff]  }
  0x24   : > { %v340_v18 = vsel %vm296_vm0, %v335_v6, %v339_v7  ;;  %v1325_v20 = vrot.slane %v1323_v8, 1  ;;  %v347_v21 = vrot.slane %v345_v13, 1  ;;  %v353_v23 = vshll.u32 %v3972_v9, 16 }
  0x25   : > { %v343_v28 = vor.u32 %v341_v0, %v339_v7  ;;  %v3993_v33 = vrot.slane %v1331_v15, 1  ;;  %v1565_v35 = vrot.slane %v3891_v10, 1  ;;  %v1566_v38 = vrot.slane %v3897_v12, 1 }
  0x26   : > { %3223 = vmatmul.mubr.msk.bf16.gmra.mrb[4].mxu1 %vm403_vm1, %v332_v62  ;;  %v1326_v26 = vsel %vm296_vm0, %v1321_v19, %v1325_v20  ;;  %v351_v29 = vor.u32 %v349_v16, %v347_v21  ;;  %v355_v30 = vrot.slane %v353_v23, 1  ;;  %v1329_v32 = vor.u32 %v1327_v14, %v1325_v20 }
  0x27   : > { %3226 = vmatprep.mubr.msk.bf16.mxu1 %vm403_vm1, %v340_v18  ;;  %3327 = vmatmul.mubr.msk.bf16.gmra.mrb[4].mxu0 %vm403_vm1, %v1318_v17  ;;  %v361_v39 = vshll.u32 %v3984_v24, 16  ;;  %v348_v40 = vsel %vm296_vm0, %v343_v28, %v347_v21  ;;  %v357_v41 = vshrl.u32 %v3972_v9, 16  ;;  %v365_v43 = vshrl.u32 %v3984_v24, 16 }
  0x28   : > { %3330 = vmatprep.mubr.msk.bf16.mxu0 %vm403_vm1, %v1326_v26  ;;  %v356_v42 = vsel %vm296_vm0, %v351_v29, %v355_v30  ;;  %v369_v44 = vshll.u32 %v3990_v31, 16  ;;  %v1334_v10 = vsel %vm296_vm0, %v1329_v32, %v3993_v33  ;;  %v1567_v12 = vsel %vm715_vm2, %v1565_v35, %v1566_v38 }
  0x29   : > { %v363_v45 = vrot.slane %v361_v39, 1  ;;  %v359_v48 = vor.u32 %v357_v41, %v355_v30  ;;  %v1568_v53 = vrot.slane %v3905_v22, 1  ;;  %v1570_v54 = vrot.slane %v3921_v34, 1  ;;  %v4030_v22 = vld [vmem:[%s4490_s1 + $0x38] sm:$0xff]  }
  0x2a   : > { %v371_v52 = vrot.slane %v369_v44, 1  ;;  %v377_v55 = vshll.u32 %v4008_v47, 16  ;;  %v373_v57 = vshrl.u32 %v3990_v31, 16  ;;  %v381_v59 = vshrl.u32 %v4008_v47, 16 }
  0x2b   : > { %v367_v51 = vor.u32 %v365_v43, %v363_v45  ;;  %v364_v56 = vsel %vm296_vm0, %v359_v48, %v363_v45  ;;  %v385_v61 = vshll.u32 %v4012_v49, 16  ;;  %v1569_v34 = vsel %vm715_vm2, %v1566_v38, %v1568_v53 }
  0x2c   : > { %v1571_v0 = vsel %vm715_vm2, %v1568_v53, %v1570_v54  ;;  %v379_v3 = vrot.slane %v377_v55, 1  ;;  %v716_v6 = vrot.slane %v3878_v4, 1  ;;  %v375_v7 = vor.u32 %v373_v57, %v371_v52  ;;  %v3704_v53 = vld [vmem:[%s3884_s19 + $0x40] sm:$0xff]   ;;  %v3705_v55 = vld [vmem:[%s3884_s19 + $0x48] sm:$0xff]  }
  0x2d   : > { %v372_v62 = vsel %vm296_vm0, %v367_v51, %v371_v52  ;;  %v1572_v8 = vrot.slane %v3939_v46, 1  ;;  %v717_v13 = vrot.slane %v3881_v5, 1  ;;  %v387_v15 = vrot.slane %v385_v61, 1 }
  0x2e   : > { %3227 = vmatmul.mubr.msk.bf16.gmra.mrb[8].mxu1 %vm403_vm1, %v348_v40  ;;  %v383_v14 = vor.u32 %v381_v59, %v379_v3  ;;  %v719_v16 = vrot.slane %v3894_v11, 1  ;;  %v1574_v17 = vrot.slane %v3956_v58, 1  ;;  %v721_v19 = vrot.slane %v3908_v25, 1  ;;  %v3703_v40 = vld [vmem:[%s3884_s19 + $0x38] sm:$0xff]  }
  0x2f   : > { %3230 = vmatprep.mubr.msk.bf16.mxu1 %vm403_vm1, %v356_v42  ;;  %3331 = vmatmul.mubr.msk.bf16.gmra.mrb[8].mxu0 %vm403_vm1, %v1334_v10  ;;  %v4048_v18 = vsel %vm715_vm2, %v716_v6, %v717_v13  ;;  %v389_v46 = vshrl.u32 %v4012_v49, 16  ;;  %v723_v21 = vrot.slane %v3925_v36, 1  ;;  %v393_v23 = vshll.u32 %v4034_v63, 16  ;;  %v4105_v59 = vld [vmem:[%s4490_s1 + $0x18] sm:$0xff]  }
  0x30   : > { %3348 = vmatprep.mubr.msk.bf16.mxu0 %vm403_vm1, %v1567_v12  ;;  %v4054_v20 = vsel %vm715_vm2, %v717_v13, %v719_v16  ;;  %v4060_v58 = vsel %vm715_vm2, %v719_v16, %v721_v19  ;;  %v725_v26 = vrot.slane %v3945_v50, 1  ;;  %v388_v28 = vsel %vm296_vm0, %v383_v14, %v387_v15 }
  0x31   : > { %v4065_v29 = vsel %vm715_vm2, %v721_v19, %v723_v21  ;;  %v727_v30 = vrot.slane %v3960_v60, 1  ;;  %v1573_v32 = vsel %vm715_vm2, %v1570_v54, %v1572_v8  ;;  %v729_v38 = vrot.slane %v3972_v9, 1 }
  0x32   : > { %v4070_v35 = vsel %vm715_vm2, %v723_v21, %v725_v26  ;;  %v1575_v39 = vsel %vm715_vm2, %v1572_v8, %v1574_v17  ;;  %v731_v42 = vrot.slane %v3984_v24, 1  ;;  %v391_v43 = vor.u32 %v389_v46, %v387_v15  ;;  %v3709_v8 = vld [vmem:[%s4020_s29] sm:$0xff]  }
  0x33   : > { %v4077_v41 = vsel %vm715_vm2, %v725_v26, %v727_v30  ;;  %v395_v44 = vrot.slane %v393_v23, 1  ;;  %v4082_v10 = vsel %vm715_vm2, %v727_v30, %v729_v38  ;;  %v1576_v12 = vrot.slane %v3966_v2, 1  ;;  %v3711_v26 = vld [vmem:[%s4020_s29 + $0x8] sm:$0xff]   ;;  %v3712_v30 = vld [vmem:[%s4020_s29 + $0x10] sm:$0xff]  }
  0x34   : > { %v4089_v45 = vsel %vm715_vm2, %v729_v38, %v731_v42  ;;  %v1578_v48 = vrot.slane %v3703_v40, 1  ;;  %v1582_v57 = vrot.slane %v3705_v55, 1  ;;  %v1335_v13 = vshrl.u32 %v3966_v2, 16 }
  0x35   : > { %v396_v51 = vsel %vm296_vm0, %v391_v43, %v395_v44  ;;  %v1577_v52 = vsel %vm715_vm2, %v1574_v17, %v1576_v12  ;;  %v1339_v14 = vshll.u32 %v3703_v40, 16  ;;  %v1351_v19 = vshrl.u32 %v3704_v53, 16 }
  0x36   : > { %3231 = vmatmul.mubr.msk.bf16.gmra.mrb[12].mxu1 %vm403_vm1, %v364_v56  ;;  %v1579_v54 = vsel %vm715_vm2, %v1576_v12, %v1578_v48  ;;  %v1580_v56 = vrot.slane %v3704_v53, 1  ;;  %v1337_v15 = vor.u32 %v1335_v13, %v3993_v33 }
  0x37   : > { %3234 = vmatprep.mubr.msk.bf16.mxu1 %vm403_vm1, %v372_v62  ;;  %3349 = vmatmul.mubr.msk.bf16.vlgmr.msra.gmra.mrb[0].mxu0 %vm403_vm1, %v1569_v34  ;;  %v3706_v62 = vld [vmem:[%s3884_s19 + $0x50] sm:$0xff]   ;;  %v3707_v34 = vld [vmem:[%s3884_s19 + $0x58] sm:$0xff]   ;;  %v1341_v16 = vrot.slane %v1339_v14, 1 }
  0x38   : > { %3373 = vmatpush3.bf16.msra.mxu0 %v3930_v37  ;;  %3352 = vmatprep.mubr.msk.bf16.mxu0 %vm403_vm1, %v1571_v0  ;;  %v380_v37 = vsel %vm296_vm0, %v375_v7, %v379_v3  ;;  %v1581_v61 = vsel %vm715_vm2, %v1578_v48, %v1580_v56  ;;  %v1584_v0 = vrot.slane %v3706_v62, 1  ;;  %v1586_v3 = vrot.slane %v3707_v34, 1 }
  0x39   : > { %3398 = vmatprep.subr.bf16.mxu0 %v4030_v22  ;;  %v4139_v2 = vsel %vm296_vm0, %v1337_v15, %v1341_v16  ;;  %v1363_v23 = vshll.u32 %v3706_v62, 16  ;;  %v1367_v43 = vshrl.u32 %v3706_v62, 16  ;;  %v1371_v44 = vshll.u32 %v3707_v34, 16  ;;  %v3718_v62 = vld [vmem:[%s4020_s29 + $0x38] sm:$0xff]   ;;  %v4233_v15 = vld [vmem:[%s4020_s29 + $0x20] sm:$0xff]  }
  0x3a   : > { %v1585_v6 = vsel %vm715_vm2, %v1582_v57, %v1584_v0 }
  0x3b   : > { %v1365_v38 = vrot.slane %v1363_v23, 1  ;;  %v737_v23 = vrot.slane %v4012_v49, 1 }
  0x3d   : > { %v1369_v48 = vor.u32 %v1367_v43, %v1365_v38 }
  0x3e   : > { %3235 = vmatmul.mubr.msk.bf16.gmra.mrb[16].mxu1 %vm403_vm1, %v380_v37  ;;  %v1359_v37 = vshrl.u32 %v3705_v55, 16 }
  0x3f   : > { %3238 = vmatprep.mubr.msk.bf16.mxu1 %vm403_vm1, %v388_v28  ;;  %3353 = vmatmul.mubr.msk.bf16.gmra.mrb[4].mxu0 %vm403_vm1, %v1573_v32 }
  0x40   : > { %3356 = vmatprep.mubr.msk.bf16.mxu0 %vm403_vm1, %v1575_v39  ;;  %v4154_v39 = vld [vmem:[%s4490_s1 + $0x40] sm:$0xff]  }
  0x46   : > { %3239 = vmatmul.mubr.msk.bf16.gmra.mrb[20].mxu1 %vm403_vm1, %v396_v51  ;;  %v1373_v51 = vrot.slane %v1371_v44, 1 }
  0x47   : > { %3244 = vmatprep.mubr.msk.bf16.mxu1 %vm403_vm1, %v3878_v4  ;;  %3357 = vmatmul.mubr.msk.bf16.gmra.mrb[8].mxu0 %vm403_vm1, %v1577_v52  ;;  %v1583_v4 = vsel %vm715_vm2, %v1580_v56, %v1582_v57  ;;  %v3715_v57 = vld [vmem:[%s4020_s29 + $0x28] sm:$0xff]  }
  0x48   : > { %3360 = vmatprep.mubr.msk.bf16.mxu0 %vm403_vm1, %v1579_v54  ;;  %v4167_v54 = vsel %vm296_vm0, %v1369_v48, %v1373_v51 }
  0x4e   : > { %3245 = vmatmul.mubr.msk.bf16.vlgmr.msra.gmra.mrb[0].mxu1 %vm403_vm1, %v3881_v5  ;;  %v3708_v5 = vld [vmem:[%s3884_s19 + $0x60] ss:$0 sps:$4 sm:$0xff]  }
  0x4f   : > { %3269 = vmatpush3.bf16.msra.mxu1 %v3914_v27  ;;  %3248 = vmatprep.mubr.msk.bf16.mxu1 %vm403_vm1, %v3894_v11  ;;  %v1587_v27 = vsel %vm715_vm2, %v1584_v0, %v1586_v3  ;;  %v1588_v11 = vrot.slane %v3708_v5, 1  ;;  %v1379_v12 = vshll.u32 %v3708_v5, 16  ;;  %v3720_v0 = vld [vmem:[%s4020_s29 + $0x48] sm:$0xff]  }
  0x50   : > { %3361 = vmatmul.mubr.msk.bf16.gmra.mrb[12].mxu0 %vm403_vm1, %v1581_v61  ;;  %3294 = vmatprep.subr.bf16.mxu1 %v4105_v59  ;;  %v3717_v61 = vld [vmem:[%s4020_s29 + $0x30] sm:$0xff]  }
  0x51   : > { %3364 = vmatprep.mubr.msk.bf16.mxu0 %vm403_vm1, %v1583_v4  ;;  %v1589_v7 = vsel %vm715_vm2, %v1586_v3, %v1588_v11  ;;  %v1381_v52 = vrot.slane %v1379_v12, 1  ;;  %v3719_v4 = vld [vmem:[%s4020_s29 + $0x40] sm:$0xff]   ;;  %v3721_v3 = vld [vmem:[%s4020_s29 + $0x50] sm:$0xff]   ;;  %v4218_v11 = vld [vmem:[%s4020_s29 + $0x18] sm:$0xff]  }
  0x52   : > { %v2156_v14 = vshll.u32 %v4218_v11, 16 }
  0x56   : > { %3249 = vmatmul.mubr.msk.bf16.gmra.mrb[4].mxu1 %vm403_vm1, %v3908_v25  ;;  %v1343_v25 = vshrl.u32 %v3703_v40, 16 }
  0x57   : > { %3252 = vmatprep.mubr.msk.bf16.mxu1 %vm403_vm1, %v3925_v36  ;;  %v1347_v36 = vshll.u32 %v3704_v53, 16  ;;  %v3713_v53 = vld [vmem:[%s4020_s29 + $0x18] sm:$0xff]  }
  0x58   : > { %3365 = vmatmul.mubr.msk.bf16.gmra.mrb[16].mxu0 %vm403_vm1, %v1585_v6  ;;  %v1345_v46 = vor.u32 %v1343_v25, %v1341_v16 }
  0x59   : > { %3368 = vmatprep.mubr.msk.bf16.mxu0 %vm403_vm1, %v1587_v27  ;;  %v1349_v17 = vrot.slane %v1347_v36, 1  ;;  %v733_v36 = vrot.slane %v3990_v31, 1 }
  0x5b   : > { %v1353_v21 = vor.u32 %v1351_v19, %v1349_v17  ;;  %v4143_v28 = vsel %vm296_vm0, %v1345_v46, %v1349_v17  ;;  %v2158_v17 = vrot.slane %v2156_v14, 1  ;;  %v4237_v19 = vld [vmem:[%s4020_s29 + $0x28] sm:$0xff]  }
  0x5e   : > { %3253 = vmatmul.mubr.msk.bf16.gmra.mrb[8].mxu1 %vm403_vm1, %v3945_v50  ;;  %v1355_v50 = vshll.u32 %v3705_v55, 16 }
  0x5f   : > { %3256 = vmatprep.mubr.msk.bf16.mxu1 %vm403_vm1, %v3960_v60 }
  0x60   : > { %3369 = vmatmul.mubr.msk.bf16.gmra.mrb[20].mxu0 %vm403_vm1, %v1589_v7  ;;  %v1357_v60 = vrot.slane %v1355_v50, 1  ;;  %v734_v50 = vsel %vm715_vm2, %v731_v42, %v733_v36 }
  0x61   : > { %3374 = vmatprep.mubr.msk.bf16.mxu0 %vm403_vm1, %v3709_v8 }
  0x62   : > { %v4147_v33 = vsel %vm296_vm0, %v1353_v21, %v1357_v60  ;;  %v1361_v32 = vor.u32 %v1359_v37, %v1357_v60  ;;  %v2168_v60 = vshrl.u32 %v4233_v15, 16  ;;  %v2172_v37 = vshll.u32 %v4237_v19, 16 }
  0x64   : > { %v4159_v40 = vsel %vm296_vm0, %v1361_v32, %v1365_v38  ;;  %v2174_v32 = vrot.slane %v2172_v37, 1  ;;  %v4260_v38 = vld [vmem:[%s4020_s29 + $0x38] sm:$0xff]  }
  0x65   : > { %v2188_v48 = vshll.u32 %v4260_v38, 16 }
  0x66   : > { %3257 = vmatmul.mubr.msk.bf16.gmra.mrb[12].mxu1 %vm403_vm1, %v3972_v9  ;;  %v1375_v9 = vshrl.u32 %v3707_v34, 16  ;;  %v4192_v34 = vld [vmem:[%s4020_s29] sm:$0xff]  }
  0x67   : > { %3260 = vmatprep.mubr.msk.bf16.mxu1 %vm403_vm1, %v3984_v24  ;;  %v735_v24 = vrot.slane %v4008_v47, 1 }
  0x68   : > { %3375 = vmatmul.mubr.msk.bf16.vlgmr.msra.gmra.mrb[0].mxu0 %vm403_vm1, %v3711_v26  ;;  %v1377_v55 = vor.u32 %v1375_v9, %v1373_v51  ;;  %v4255_v26 = vld [vmem:[%s4020_s29 + $0x30] sm:$0xff]   ;;  %v2176_v9 = vshrl.u32 %v4237_v19, 16  ;;  %v739_v51 = vrot.slane %v4034_v63, 1 }
  0x69   : > { %3399 = vmatpush3.bf16.msra.mxu0 %v4030_v22  ;;  %3378 = vmatprep.mubr.msk.bf16.mxu0 %vm403_vm1, %v3712_v30  ;;  %v3714_v22 = vld [vmem:[%s4020_s29 + $0x20] sm:$0xff]   ;;  %v736_v43 = vsel %vm715_vm2, %v733_v36, %v735_v24  ;;  %v2180_v44 = vshll.u32 %v4255_v26, 16  ;;  %v2184_v12 = vshrl.u32 %v4255_v26, 16 }
  0x6a   : > { %3424 = vmatprep.subr.bf16.mxu0 %v4154_v39  ;;  %v4173_v56 = vsel %vm296_vm0, %v1377_v55, %v1381_v52  ;;  %v2178_v55 = vor.u32 %v2176_v9, %v2174_v32  ;;  %v3743_v9 = vld [vmem:[%s3884_s19 + $0x30] sm:$0xff]  }
  0x6b   : > { %v2182_v52 = vrot.slane %v2180_v44, 1  ;;  %v2414_v44 = vrot.slane %v4192_v34, 1 }
  0x6d   : > { %v2183_v63 = vsel %vm296_vm0, %v2178_v55, %v2182_v52 }
  0x6e   : > { %3261 = vmatmul.mubr.msk.bf16.gmra.mrb[16].mxu1 %vm403_vm1, %v3990_v31  ;;  %v2160_v31 = vshrl.u32 %v4218_v11, 16 }
  0x6f   : > { %3264 = vmatprep.mubr.msk.bf16.mxu1 %vm403_vm1, %v4008_v47  ;;  %v738_v47 = vsel %vm715_vm2, %v735_v24, %v737_v23  ;;  %v3739_v24 = vld [vmem:[%s3884_s19 + $0x20] sm:$0xff]  }
  0x70   : > { %3379 = vmatmul.mubr.msk.bf16.gmra.mrb[4].mxu0 %vm403_vm1, %v3713_v53  ;;  %v4275_v53 = vld [vmem:[%s4020_s29 + $0x40] sm:$0xff]  }
  0x71   : > { %3382 = vmatprep.mubr.msk.bf16.mxu0 %vm403_vm1, %v3714_v22  ;;  %v2186_v22 = vor.u32 %v2184_v12, %v2182_v52 }
  0x76   : > { %3265 = vmatmul.mubr.msk.bf16.gmra.mrb[20].mxu1 %vm403_vm1, %v4012_v49 }
  0x77   : > { %3270 = vmatprep.mubr.msk.bf16.mxu1 %vm403_vm1, %v4048_v18  ;;  %v4201_v18 = vld [vmem:[%s4020_s29 + $0x8] sm:$0xff]  }
  0x78   : > { %3383 = vmatmul.mubr.msk.bf16.gmra.mrb[8].mxu0 %vm403_vm1, %v3715_v57  ;;  %v2140_v6 = vshll.u32 %v4201_v18, 16  ;;  %v2144_v8 = vshrl.u32 %v4201_v18, 16  ;;  %v2190_v57 = vrot.slane %v2188_v48, 1 }
  0x79   : > { %3386 = vmatprep.mubr.msk.bf16.mxu0 %vm403_vm1, %v3717_v61  ;;  %v4279_v61 = vld [vmem:[%s4020_s29 + $0x48] sm:$0xff]  }
  0x7a   : > { %v2142_v27 = vrot.slane %v2140_v6, 1  ;;  %v2208_v36 = vshrl.u32 %v4279_v61, 16 }
  0x7c   : > { %v2146_v16 = vor.u32 %v2144_v8, %v2142_v27 }
  0x7e   : > { %3271 = vmatmul.mubr.msk.bf16.vlgmr.msra.gmra.mrb[0].mxu1 %vm403_vm1, %v4054_v20  ;;  %v2135_v20 = vshll.u32 %v4192_v34, 16 }
  0x7f   : > { %3295 = vmatpush3.bf16.msra.mxu1 %v4105_v59  ;;  %3274 = vmatprep.mubr.msk.bf16.mxu1 %vm403_vm1, %v4060_v58  ;;  %v2133_v59 = vshrl.u32 %v4192_v34, 16  ;;  %v3744_v34 = vld [vmem:[%s3884_s19 + $0x38] sm:$0xff]  }
  0x80   : > { %3387 = vmatmul.mubr.msk.bf16.gmra.mrb[12].mxu0 %vm403_vm1, %v3718_v62  ;;  %3450 = vmatprep.subr.bf16.mxu1 %v3848_v1  ;;  %v2137_v58 = vrot.slane %v2135_v20, 1  ;;  %v4214_v1 = vld [vmem:[%s4020_s29 + $0x10] sm:$0xff]   ;;  %v740_v62 = vsel %vm715_vm2, %v737_v23, %v739_v51  ;;  %v2196_v20 = vshll.u32 %v4275_v53, 16  ;;  %v3745_v51 = vld [vmem:[%s3884_s19 + $0x40] sm:$0xff]  }
  0x81   : > { %3390 = vmatprep.mubr.msk.bf16.mxu0 %vm403_vm1, %v3719_v4  ;;  %v2148_v7 = vshll.u32 %v4214_v1, 16  ;;  %v2152_v13 = vshrl.u32 %v4214_v1, 16  ;;  %v3731_v4 = vld [vmem:[%s3884_s19] sm:$0xff]   ;;  %v2417_v48 = vrot.slane %v4214_v1, 1  ;;  %v3746_v1 = vld [vmem:[%s3884_s19 + $0x48] sm:$0xff]  }
  0x82   : > { %v2138_v5 = vor.u32 %v2137_v58, %v2133_v59  ;;  %v2200_v59 = vshrl.u32 %v4275_v53, 16  ;;  %v2204_v58 = vshll.u32 %v4279_v61, 16  ;;  %v2198_v6 = vrot.slane %v2196_v20, 1 }
  0x83   : > { %v2150_v25 = vrot.slane %v2148_v7, 1  ;;  %v2425_v20 = vrot.slane %v4255_v26, 1  ;;  %v2431_v26 = vrot.slane %v4279_v61, 1 }
  0x84   : > { %v2202_v7 = vor.u32 %v2200_v59, %v2198_v6  ;;  %v2206_v8 = vrot.slane %v2204_v58, 1 }
  0x85   : > { %v2151_v46 = vsel %vm296_vm0, %v2146_v16, %v2150_v25 }
  0x86   : > { %3275 = vmatmul.mubr.msk.bf16.gmra.mrb[4].mxu1 %vm403_vm1, %v4065_v29  ;;  %v3722_v29 = vld [vmem:[%s4020_s29 + $0x58] sm:$0xff]   ;;  %v2207_v16 = vsel %vm296_vm0, %v2202_v7, %v2206_v8 }
  0x87   : > { %3278 = vmatprep.mubr.msk.bf16.mxu1 %vm403_vm1, %v4070_v35  ;;  %v2143_v35 = vsel %vm296_vm0, %v2138_v5, %v2142_v27  ;;  %v4293_v5 = vld [vmem:[%s4020_s29 + $0x50] sm:$0xff]  }
  0x88   : > { %3391 = vmatmul.mubr.msk.bf16.gmra.mrb[16].mxu0 %vm403_vm1, %v3720_v0  ;;  %v2192_v0 = vshrl.u32 %v4260_v38, 16  ;;  %v2212_v14 = vshll.u32 %v4293_v5, 16 }
  0x89   : > { %3394 = vmatprep.mubr.msk.bf16.mxu0 %vm403_vm1, %v3721_v3  ;;  %v2191_v3 = vsel %vm296_vm0, %v2186_v22, %v2190_v57  ;;  %v2421_v22 = vrot.slane %v4233_v15, 1 }
  0x8a   : > { %v2194_v27 = vor.u32 %v2192_v0, %v2190_v57  ;;  %v2423_v57 = vrot.slane %v4237_v19, 1 }
  0x8c   : > { %v2426_v19 = vsel %vm715_vm2, %v2423_v57, %v2425_v20 }
  0x8e   : > { %3279 = vmatmul.mubr.msk.bf16.gmra.mrb[8].mxu1 %vm403_vm1, %v4077_v41  ;;  %v2154_v41 = vor.u32 %v2152_v13, %v2150_v25  ;;  %v3735_v13 = vld [vmem:[%s3884_s19 + $0x10] sm:$0xff]   ;;  %v2199_v25 = vsel %vm296_vm0, %v2194_v27, %v2198_v6 }
  0x8f   : > { %3282 = vmatprep.mubr.msk.bf16.mxu1 %vm403_vm1, %v4082_v10  ;;  %v2164_v10 = vshll.u32 %v4233_v15, 16  ;;  %v2427_v15 = vrot.slane %v4260_v38, 1 }
  0x90   : > { %3395 = vmatmul.mubr.msk.bf16.gmra.mrb[20].mxu0 %vm403_vm1, %v3722_v29  ;;  %v2159_v21 = vsel %vm296_vm0, %v2154_v41, %v2158_v17  ;;  %v3733_v29 = vld [vmem:[%s3884_s19 + $0x8] sm:$0xff]   ;;  %v2216_v41 = vshrl.u32 %v4293_v5, 16 }
  0x91   : > { %3400 = vmatprep.mubr.msk.bf16.mxu0 %vm403_vm1, %v2143_v35  ;;  %v2166_v42 = vrot.slane %v2164_v10, 1  ;;  %v4298_v35 = vld [vmem:[%s4020_s29 + $0x58] sm:$0xff]   ;;  %v2214_v10 = vrot.slane %v2212_v14, 1  ;;  %v2428_v0 = vsel %vm715_vm2, %v2425_v20, %v2427_v15 }
  0x92   : > { %v2224_v23 = vshrl.u32 %v4298_v35, 16 }
  0x93   : > { %v2170_v30 = vor.u32 %v2168_v60, %v2166_v42  ;;  %v2218_v60 = vor.u32 %v2216_v41, %v2214_v10 }
  0x96   : > { %3283 = vmatmul.mubr.msk.bf16.gmra.mrb[12].mxu1 %vm403_vm1, %v4089_v45  ;;  %v2162_v45 = vor.u32 %v2160_v31, %v2158_v17  ;;  %v2220_v17 = vshll.u32 %v4298_v35, 16  ;;  %v4315_v31 = vld [vmem:[%s4020_s29 + $0x60] ss:$0 sps:$4 sm:$0xff]  }
  0x97   : > { %3286 = vmatprep.mubr.msk.bf16.mxu1 %vm403_vm1, %v734_v50  ;;  %v3749_v50 = vld [vmem:[%s4490_s1 + $0x20] sm:$0xff]  }
  0x98   : > { %3401 = vmatmul.mubr.msk.bf16.vlgmr.msra.gmra.mrb[0].mxu0 %vm403_vm1, %v2151_v46  ;;  %v2167_v49 = vsel %vm296_vm0, %v2162_v45, %v2166_v42  ;;  %v2210_v46 = vor.u32 %v2208_v36, %v2206_v8  ;;  %v2222_v37 = vrot.slane %v2220_v17, 1  ;;  %v2228_v45 = vshll.u32 %v4315_v31, 16 }
  0x99   : > { %3425 = vmatpush3.bf16.msra.mxu0 %v4154_v39  ;;  %3404 = vmatprep.mubr.msk.bf16.mxu0 %vm403_vm1, %v2159_v21  ;;  %v2175_v39 = vsel %vm296_vm0, %v2170_v30, %v2174_v32  ;;  %v3737_v21 = vld [vmem:[%s3884_s19 + $0x18] sm:$0xff]  }
  0x9a   : > { %v2215_v42 = vsel %vm296_vm0, %v2210_v46, %v2214_v10  ;;  %v2223_v30 = vsel %vm296_vm0, %v2218_v60, %v2222_v37  ;;  %v2226_v32 = vor.u32 %v2224_v23, %v2222_v37 }
  0x9e   : > { %3287 = vmatmul.mubr.msk.bf16.gmra.mrb[16].mxu1 %vm403_vm1, %v736_v43  ;;  %v2230_v43 = vrot.slane %v2228_v45, 1 }
  0x9f   : > { %3290 = vmatprep.mubr.msk.bf16.mxu1 %vm403_vm1, %v738_v47  ;;  %v3741_v47 = vld [vmem:[%s3884_s19 + $0x28] sm:$0xff]  }
  0xa0   : > { %3405 = vmatmul.mubr.msk.bf16.gmra.mrb[4].mxu0 %vm403_vm1, %v2167_v49  ;;  %v2415_v49 = vrot.slane %v4201_v18, 1  ;;  %v2419_v18 = vrot.slane %v4218_v11, 1  ;;  %v3747_v11 = vld [vmem:[%s3884_s19 + $0x50] sm:$0xff]  }
  0xa1   : > { %3408 = vmatprep.mubr.msk.bf16.mxu0 %vm403_vm1, %v2175_v39  ;;  %v2231_v39 = vsel %vm296_vm0, %v2226_v32, %v2230_v43 }
  0xa2   : > { %v2416_v12 = vsel %vm715_vm2, %v2414_v44, %v2415_v49  ;;  %v2418_v52 = vsel %vm715_vm2, %v2415_v49, %v2417_v48  ;;  %v2420_v55 = vsel %vm715_vm2, %v2417_v48, %v2419_v18 }
  0xa6   : > { %3291 = vmatmul.mubr.msk.bf16.gmra.mrb[20].mxu1 %vm403_vm1, %v740_v62  ;;  %v2422_v62 = vsel %vm715_vm2, %v2419_v18, %v2421_v22 }
  0xa7   : > { %3296 = vmatprep.mubr.msk.bf16.mxu1 %vm403_vm1, %v3731_v4  ;;  %v2424_v4 = vsel %vm715_vm2, %v2421_v22, %v2423_v57 }
  0xa8   : > { %3409 = vmatmul.mubr.msk.bf16.gmra.mrb[8].mxu0 %vm403_vm1, %v2183_v63  ;;  %v3748_v63 = vld [vmem:[%s3884_s19 + $0x58] sm:$0xff]  }
  0xa9   : > { %3412 = vmatprep.mubr.msk.bf16.mxu0 %vm403_vm1, %v2191_v3  ;;  %v2429_v3 = vrot.slane %v4275_v53, 1  ;;  %v2435_v53 = vrot.slane %v4298_v35, 1 }
  0xab   : > { %v2430_v59 = vsel %vm715_vm2, %v2427_v15, %v2429_v3  ;;  %v2432_v38 = vsel %vm715_vm2, %v2429_v3, %v2431_v26 }
  0xae   : > { %3297 = vmatmul.mubr.msk.bf16.vlgmr.msra.gmra.mrb[0].mxu1 %vm403_vm1, %v3733_v29 }
  0xaf   : > { %3451 = vmatpush3.bf16.msra.mxu1 %v3749_v50  ;;  %3300 = vmatprep.mubr.msk.bf16.mxu1 %vm403_vm1, %v3735_v13  ;;  %v4403_v50 = vld [vmem:[%s4491_s2 + $0x1] ss:$0 sm:$0xff] }
  0xb0   : > { %3413 = vmatmul.mubr.msk.bf16.gmra.mrb[12].mxu0 %vm403_vm1, %v2199_v25 }
  0xb1   : > { %3416 = vmatprep.mubr.msk.bf16.mxu0 %vm403_vm1, %v2207_v16  ;;  %v4398_v16 = vld [vmem:[%s4491_s2] ss:$0 sm:$0xff] }
  0xb6   : > { %3301 = vmatmul.mubr.msk.bf16.gmra.mrb[4].mxu1 %vm403_vm1, %v3737_v21 }
  0xb7   : > { %3304 = vmatprep.mubr.msk.bf16.mxu1 %vm403_vm1, %v3739_v24 }
  0xb8   : > { %3417 = vmatmul.mubr.msk.bf16.gmra.mrb[16].mxu0 %vm403_vm1, %v2215_v42 }
  0xb9   : > { %3420 = vmatprep.mubr.msk.bf16.mxu0 %vm403_vm1, %v2223_v30 }
  0xbe   : > { %3305 = vmatmul.mubr.msk.bf16.gmra.mrb[8].mxu1 %vm403_vm1, %v3741_v47 }
  0xbf   : > { %3308 = vmatprep.mubr.msk.bf16.mxu1 %vm403_vm1, %v3743_v9 }
  0xc0   : > { %3421 = vmatmul.mubr.msk.bf16.gmra.mrb[20].mxu0 %vm403_vm1, %v2231_v39 }
  0xc1   : > { %3426 = vmatprep.mubr.msk.bf16.mxu0 %vm403_vm1, %v2416_v12 }
  0xc6   : > { %3309 = vmatmul.mubr.msk.bf16.gmra.mrb[12].mxu1 %vm403_vm1, %v3744_v34 }
  0xc7   : > { %3312 = vmatprep.mubr.msk.bf16.mxu1 %vm403_vm1, %v3745_v51 }
  0xc8   : > { %3427 = vmatmul.mubr.msk.bf16.vlgmr.msra.gmra.mrb[0].mxu0 %vm403_vm1, %v2418_v52 }
  0xc9   : > { %3430 = vmatprep.mubr.msk.bf16.mxu0 %vm403_vm1, %v2420_v55 }
  0xce   : > { %3313 = vmatmul.mubr.msk.bf16.gmra.mrb[16].mxu1 %vm403_vm1, %v3746_v1 }
  0xcf   : > { %3316 = vmatprep.mubr.msk.bf16.mxu1 %vm403_vm1, %v3747_v11 }
  0xd0   : > { %3431 = vmatmul.mubr.msk.bf16.gmra.mrb[4].mxu0 %vm403_vm1, %v2422_v62 }
  0xd1   : > { %3434 = vmatprep.mubr.msk.bf16.mxu0 %vm403_vm1, %v2424_v4 }
  0xd6   : > { %3317 = vmatmul.mubr.msk.bf16.gmra.mrb[20].mxu1 %vm403_vm1, %v3748_v63 }
  0xd7   : > { %3334 = vmatprep.mubr.msk.bf16.mxu1 %vm403_vm1, %v4139_v2  ;;  %v2433_v2 = vrot.slane %v4293_v5, 1 }
  0xd8   : > { %3435 = vmatmul.mubr.msk.bf16.gmra.mrb[8].mxu0 %vm403_vm1, %v2426_v19 }
  0xd9   : > { %3438 = vmatprep.mubr.msk.bf16.mxu0 %vm403_vm1, %v2428_v0  ;;  %v2434_v61 = vsel %vm715_vm2, %v2431_v26, %v2433_v2 }
  0xde   : > { %3335 = vmatmul.mubr.msk.bf16.vlgmr.msra.gmra.mrb[12].mxu1 %vm403_vm1, %v4143_v28  ;;  %v2436_v28 = vsel %vm715_vm2, %v2433_v2, %v2435_v53 }
  0xdf   : > { %3338 = vmatprep.mubr.msk.bf16.mxu1 %vm403_vm1, %v4147_v33  ;;  %v2437_v33 = vrot.slane %v4315_v31, 1 }
  0xe0   : > { %3439 = vmatmul.mubr.msk.bf16.gmra.mrb[12].mxu0 %vm403_vm1, %v2430_v59 }
  0xe1   : > { %3442 = vmatprep.mubr.msk.bf16.mxu0 %vm403_vm1, %v2432_v38  ;;  %v2438_v58 = vsel %vm715_vm2, %v2435_v53, %v2437_v33 }
  0xe6   : > { %3339 = vmatmul.mubr.msk.bf16.gmra.mrb[16].mxu1 %vm403_vm1, %v4159_v40 }
  0xe7   : > { %3342 = vmatprep.mubr.msk.bf16.mxu1 %vm403_vm1, %v4167_v54 }
  0xe8   : > { %3443 = vmatmul.mubr.msk.bf16.gmra.mrb[16].mxu0 %vm403_vm1, %v2434_v61 }
  0xe9   : > { %3446 = vmatprep.mubr.msk.bf16.mxu0 %vm403_vm1, %v2436_v28 }
  0xee   : > { %3343 = vmatmul.mubr.msk.bf16.gmra.mrb[20].mxu1 %vm403_vm1, %v4173_v56 }
  0xf0   : > { %3447 = vmatmul.mubr.msk.bf16.gmra.mrb[20].mxu0 %vm403_vm1, %v2438_v58 }
 0x181   : > { %v3298_v40 = vpop.f32.mrb[0].mxu1 }
 0x182   : > { %v1089_v6 = vpop.f32.mrb[1].mxu1 }
 0x183   : > { %v3299_v5 = vpop.f32.mrb[2].mxu1 }
 0x184   : > { %v1092_v54 = vpop.f32.mrb[3].mxu1 }
 0x189   : > { %v3302_v27 = vpop.f32.mrb[4].mxu1 }
 0x18a   : > { %v1104_v29 = vpop.f32.mrb[5].mxu1 }
 0x18b   : > { %v3303_v7 = vpop.f32.mrb[6].mxu1 }
 0x18c   : > { %v1107_v8 = vpop.f32.mrb[7].mxu1 }
 0x191   : > { %v3306_v35 = vpop.f32.mrb[8].mxu1 }
 0x192   : > { %v1119_v13 = vpop.f32.mrb[9].mxu1 }
 0x193   : > { %v3307_v14 = vpop.f32.mrb[10].mxu1 }
 0x194   : > { %v1121_v25 = vpop.f32.mrb[11].mxu1 }
 0x19b   : > { %v3428_v36 = vpop.f32.mrb[0].mxu0 }
 0x19c   : > { %v2515_v56 = vpop.f32.mrb[1].mxu0 }
 0x19d   : > { %v3452_v41 = vadd.f32 %v2515_v56, %v1089_v6  ;;  %v3429_v17 = vpop.f32.mrb[2].mxu0 }
 0x19e   : > { %v3453_v10 = vadd.f32 %v3429_v17, %v3299_v5  ;;  %v2518_v46 = vpop.f32.mrb[3].mxu0 }
 0x19f   : > { %v2623_v31 = vmul.f32 %v3452_v41, %v4398_v16  ;;  %v3454_v21 = vadd.f32 %v2518_v46, %v1092_v54 }
 0x1a0   : > { %v2625_v60 = vmul.f32 %v3453_v10, %v4398_v16 }
 0x1a1   : > { %v2644_v37 = vadd.f32 %v4403_v50, %v2623_v31  ;;  %v2624_v24 = vmul.f32 %v3454_v21, %v4398_v16 }
 0x1a2   : > { %v2646_v42 = vadd.f32 %v4403_v50, %v2625_v60 }
 0x1a3   : > { %v2660_v23 = vmax.f32 %v2644_v37, 0.0  ;;  %v2645_v45 = vadd.f32 %v4403_v50, %v2624_v24  ;;  %v3432_v30 = vpop.f32.mrb[4].mxu0 }
 0x1a4   : > { %v2662_v32 = vmax.f32 %v2646_v42, 0.0  ;;  %v3455_v43 = vadd.f32 %v3432_v30, %v3302_v27  ;;  %v2530_v47 = vpop.f32.mrb[5].mxu0 }
 0x1a5   : > { %v3083_v44 = vpack.c.bf16 %v2660_v23, %v2660_v23  ;;  %v2661_v49 = vmax.f32 %v2645_v45, 0.0  ;;  %v3456_v9 = vadd.f32 %v2530_v47, %v1104_v29  ;;  %v3433_v39 = vpop.f32.mrb[6].mxu0 }
 0x1a6   : > { %v3085_v12 = vpack.c.bf16 %v2662_v32, %v2662_v32  ;;  %v2627_v48 = vmul.f32 %v3455_v43, %v4398_v16  ;;  %v3457_v34 = vadd.f32 %v3433_v39, %v3303_v7  ;;  %v2533_v18 = vpop.f32.mrb[7].mxu0 }
 0x1a7   : > { %2741 = vst.msk [vmem:[%s4414_s26] sm:$0xf] %vm2740_vm3, %v3083_v44  ;;  %v3084_v51 = vpack.c.bf16 %v2661_v49, %v2661_v49  ;;  %v2626_v52 = vmul.f32 %v3456_v9, %v4398_v16 }
 0x1a8   : > { %2743 = vst.msk [vmem:[%s4414_s26 + $0x8] sm:$0xf] %vm2740_vm3, %v3085_v12  ;;  %v2648_v55 = vadd.f32 %v4403_v50, %v2627_v48  ;;  %v2628_v22 = vmul.f32 %v3457_v34, %v4398_v16 }
 0x1a9   : > { %2742 = vst.msk [vmem:[%s4414_s26 + $0x4] sm:$0xf] %vm2740_vm3, %v3084_v51  ;;  %v2647_v1 = vadd.f32 %v4403_v50, %v2626_v52 }
 0x1aa   : > { %v2664_v57 = vmax.f32 %v2648_v55, 0.0  ;;  %v2649_v11 = vadd.f32 %v4403_v50, %v2628_v22 }
 0x1ab   : > { %v2663_v62 = vmax.f32 %v2647_v1, 0.0  ;;  %v3436_v4 = vpop.f32.mrb[8].mxu0 }
 0x1ac   : > { %v3087_v20 = vpack.c.bf16 %v2664_v57, %v2664_v57  ;;  %v2665_v63 = vmax.f32 %v2649_v11, 0.0  ;;  %v3458_v15 = vadd.f32 %v3436_v4, %v3306_v35  ;;  %v2545_v19 = vpop.f32.mrb[9].mxu0 }
 0x1ad   : > { %v3086_v0 = vpack.c.bf16 %v2663_v62, %v2663_v62  ;;  %v3437_v3 = vpop.f32.mrb[10].mxu0 }
 0x1ae   : > { %2745 = vst.msk [vmem:[%s4414_s26 + $0x10] sm:$0xf] %vm2740_vm3, %v3087_v20  ;;  %v3088_v26 = vpack.c.bf16 %v2665_v63, %v2665_v63  ;;  %v2630_v59 = vmul.f32 %v3458_v15, %v4398_v16  ;;  %v2547_v38 = vpop.f32.mrb[11].mxu0 }
 0x1af   : > { %2744 = vst.msk [vmem:[%s4414_s26 + $0xc] sm:$0xf] %vm2740_vm3, %v3086_v0  ;;  %v3459_v2 = vadd.f32 %v2547_v38, %v1121_v25 }
 0x1b0   : > { %2746 = vst.msk [vmem:[%s4414_s26 + $0x14] sm:$0xf] %vm2740_vm3, %v3088_v26  ;;  %v2651_v53 = vadd.f32 %v4403_v50, %v2630_v59 }
 0x1b1   : > { %v2629_v61 = vmul.f32 %v3459_v2, %v4398_v16  ;;  %v3336_v28 = vpop.f32.mrb[12].mxu1 }
 0x1b2   : > { %v2667_v33 = vmax.f32 %v2651_v53, 0.0  ;;  %v1503_v58 = vpop.f32.mrb[13].mxu1 }
 0x1b3   : > { %v2650_v40 = vadd.f32 %v4403_v50, %v2629_v61  ;;  %v3440_v6 = vpop.f32.mrb[12].mxu0  ;;  %v3337_v5 = vpop.f32.mrb[14].mxu1 }
 0x1b4   : > { %v3090_v54 = vpack.c.bf16 %v2667_v33, %v2667_v33  ;;  %v2559_v27 = vpop.f32.mrb[13].mxu0  ;;  %v1506_v29 = vpop.f32.mrb[15].mxu1 }
 0x1b5   : > { %v2666_v7 = vmax.f32 %v2650_v40, 0.0  ;;  %v3460_v8 = vadd.f32 %v2559_v27, %v1503_v58  ;;  %v3441_v35 = vpop.f32.mrb[14].mxu0 }
 0x1b6   : > { %2748 = vst.msk [vmem:[%s4414_s26 + $0x1c] sm:$0xf] %vm2740_vm3, %v3090_v54  ;;  %v3461_v13 = vadd.f32 %v3441_v35, %v3337_v5  ;;  %v2562_v14 = vpop.f32.mrb[15].mxu0 }
 0x1b7   : > { %v3089_v25 = vpack.c.bf16 %v2666_v7, %v2666_v7  ;;  %v2631_v36 = vmul.f32 %v3460_v8, %v4398_v16  ;;  %v3462_v56 = vadd.f32 %v2562_v14, %v1506_v29 }
 0x1b8   : > { %v2633_v41 = vmul.f32 %v3461_v13, %v4398_v16 }
 0x1b9   : > { %2747 = vst.msk [vmem:[%s4414_s26 + $0x18] sm:$0xf] %vm2740_vm3, %v3089_v25  ;;  %v2652_v17 = vadd.f32 %v4403_v50, %v2631_v36  ;;  %v2632_v10 = vmul.f32 %v3462_v56, %v4398_v16  ;;  %v3340_v46 = vpop.f32.mrb[16].mxu1 }
 0x1ba   : > { %v2654_v31 = vadd.f32 %v4403_v50, %v2633_v41  ;;  %v1518_v21 = vpop.f32.mrb[17].mxu1 }
 0x1bb   : > { %v2668_v60 = vmax.f32 %v2652_v17, 0.0  ;;  %v2653_v37 = vadd.f32 %v4403_v50, %v2632_v10  ;;  %v3444_v24 = vpop.f32.mrb[16].mxu0  ;;  %v3341_v42 = vpop.f32.mrb[18].mxu1 }
 0x1bc   : > { %v2670_v23 = vmax.f32 %v2654_v31, 0.0  ;;  %v3463_v45 = vadd.f32 %v3444_v24, %v3340_v46  ;;  %v2574_v30 = vpop.f32.mrb[17].mxu0  ;;  %v1521_v32 = vpop.f32.mrb[19].mxu1 }
 0x1bd   : > { %v3091_v43 = vpack.c.bf16 %v2668_v60, %v2668_v60  ;;  %v2669_v47 = vmax.f32 %v2653_v37, 0.0  ;;  %v3464_v44 = vadd.f32 %v2574_v30, %v1518_v21  ;;  %v3445_v49 = vpop.f32.mrb[18].mxu0 }
 0x1be   : > { %v3093_v9 = vpack.c.bf16 %v2670_v23, %v2670_v23  ;;  %v2635_v39 = vmul.f32 %v3463_v45, %v4398_v16  ;;  %v3465_v12 = vadd.f32 %v3445_v49, %v3341_v42  ;;  %v2577_v48 = vpop.f32.mrb[19].mxu0 }
 0x1bf   : > { %2749 = vst.msk [vmem:[%s4414_s26 + $0x20] sm:$0xf] %vm2740_vm3, %v3091_v43  ;;  %v3092_v34 = vpack.c.bf16 %v2669_v47, %v2669_v47  ;;  %v2634_v18 = vmul.f32 %v3464_v44, %v4398_v16 }
 0x1c0   : > { %2751 = vst.msk [vmem:[%s4414_s26 + $0x28] sm:$0xf] %vm2740_vm3, %v3093_v9  ;;  %v2656_v51 = vadd.f32 %v4403_v50, %v2635_v39  ;;  %v2636_v52 = vmul.f32 %v3465_v12, %v4398_v16 }
 0x1c1   : > { %2750 = vst.msk [vmem:[%s4414_s26 + $0x24] sm:$0xf] %vm2740_vm3, %v3092_v34  ;;  %v2655_v55 = vadd.f32 %v4403_v50, %v2634_v18  ;;  %v3344_v22 = vpop.f32.mrb[20].mxu1 }
 0x1c2   : > { %v2672_v1 = vmax.f32 %v2656_v51, 0.0  ;;  %v2657_v57 = vadd.f32 %v4403_v50, %v2636_v52  ;;  %v1533_v11 = vpop.f32.mrb[21].mxu1 }
 0x1c3   : > { %v2671_v62 = vmax.f32 %v2655_v55, 0.0  ;;  %v3448_v4 = vpop.f32.mrb[20].mxu0  ;;  %v3345_v20 = vpop.f32.mrb[22].mxu1 }
 0x1c4   : > { %v3095_v63 = vpack.c.bf16 %v2672_v1, %v2672_v1  ;;  %v2673_v15 = vmax.f32 %v2657_v57, 0.0  ;;  %v3466_v19 = vadd.f32 %v3448_v4, %v3344_v22  ;;  %v2589_v0 = vpop.f32.mrb[21].mxu0  ;;  %v1535_v3 = vpop.f32.mrb[23].mxu1 }
 0x1c5   : > { %v3094_v26 = vpack.c.bf16 %v2671_v62, %v2671_v62  ;;  %v3449_v59 = vpop.f32.mrb[22].mxu0 }
 0x1c6   : > { %2753 = vst.msk [vmem:[%s4414_s26 + $0x30] sm:$0xf] %vm2740_vm3, %v3095_v63  ;;  %v3096_v38 = vpack.c.bf16 %v2673_v15, %v2673_v15  ;;  %v2638_v2 = vmul.f32 %v3466_v19, %v4398_v16  ;;  %v2591_v53 = vpop.f32.mrb[23].mxu0 }
 0x1c7   : > { %2752 = vst.msk [vmem:[%s4414_s26 + $0x2c] sm:$0xf] %vm2740_vm3, %v3094_v26  ;;  %v3467_v61 = vadd.f32 %v2591_v53, %v1535_v3 }
 0x1c8   : > { %2754 = vst.msk [vmem:[%s4414_s26 + $0x34] sm:$0xf] %vm2740_vm3, %v3096_v38  ;;  %v2659_v28 = vadd.f32 %v4403_v50, %v2638_v2 }
 0x1c9   : > { %v2637_v33 = vmul.f32 %v3467_v61, %v4398_v16 }
 0x1ca   : > { %v2675_v58 = vmax.f32 %v2659_v28, 0.0 }
 0x1cb   : > { %v2658_v40 = vadd.f32 %v4403_v50, %v2637_v33 }
 0x1cc   : > { %v3098_v6 = vpack.c.bf16 %v2675_v58, %v2675_v58 }
 0x1cd   : > { %v2674_v5 = vmax.f32 %v2658_v40, 0.0 }
 0x1ce   : > { %2756 = vst.msk [vmem:[%s4414_s26 + $0x3c] sm:$0xf] %vm2740_vm3, %v3098_v6 }
 0x1cf   : > { %v3097_v54 = vpack.c.bf16 %v2674_v5, %v2674_v5 }
 0x1d1   : > { %2755 = vst.msk [vmem:[%s4414_s26 + $0x38] sm:$0xf] %vm2740_vm3, %v3097_v54 }
 0x1d2 PF: > { %s13_s16 = sadd.s32 1, %s3788_s16   ;;  %s4493_s12 = smov %s3780_s14 }
 0x1d3   : > { %p10_p7 = scmp.ge.s32.totalorder %s13_s16, 6   ;;  %s4494_s13 = smov %s3784_s15 }
 0x1d4   : > { %s4495_s14 = smov %s4498_s17  ;;  %s4496_s15 = smov %s4502_s18 }
 0x1d5   :  { %12 = sbr.rel (!%p10_p7) target bundleno = 3 (0x3), region = 73 }

</bundles_post_ra>
